<compile_context>
chip_gen: v7x
topology: tpu7x:2x2x1
jax: 0.10.0
libtpu: 0.0.40
codegen_flags: <defaults>
</compile_context>

<pallas_src>
import jax
import jax.numpy as jnp
from jax.experimental import pallas as pl
from jax.experimental.pallas import tpu as pltpu


# ----------------------------------------------------------------------------
# small static helpers
# ----------------------------------------------------------------------------
def _round_up(x, m):
    return ((x + m - 1) // m) * m


def _time_chunk(S, max_chunk=16):
    """Largest divisor of S that is <= max_chunk (steps per grid iteration)."""
    for t in range(min(S, max_chunk), 0, -1):
        if S % t == 0:
            return t
    return 1


def _row_block(N, max_rows=512):
    """Largest multiple-of-8 divisor of N that is <= max_rows."""
    for bm in range(min(N, max_rows), 0, -1):
        if N % bm == 0 and bm % 8 == 0:
            return bm
    return N


# ----------------------------------------------------------------------------
# shared matmul-accumulate body:  out = sum_k x_k @ w_k + b
# ----------------------------------------------------------------------------
def _accum_body(n_in, refs):
    x_refs = refs[:n_in]
    w_refs = refs[n_in:2 * n_in]
    b_ref = refs[2 * n_in]
    o_ref = refs[2 * n_in + 1]
    acc = jnp.dot(x_refs[0][...], w_refs[0][...],
                  preferred_element_type=jnp.float32)
    for xr, wr in zip(x_refs[1:], w_refs[1:]):
        acc = acc + jnp.dot(xr[...], wr[...],
                            preferred_element_type=jnp.float32)
    o_ref[...] = (acc + b_ref[...]).astype(o_ref.dtype)


# ----------------------------------------------------------------------------
# hoisted input projection for one BLSTM layer (both directions):
#   xs: list of (N, K_k) inputs shared by both directions
#   ws: list of (2, K_k, 4H) direction-stacked weights, bias: (2, 1, 4H)
#   -> (2, N, 4H) pre-computed x-gates
# ----------------------------------------------------------------------------
def _gate_projection(xs, ws, bias, G4):
    N = xs[0].shape[0]
    bm = _row_block(N)
    n_in = len(xs)

    def kernel(*refs):
        _accum_body(n_in, refs)

    in_specs = (
        [pl.BlockSpec((bm, x.shape[1]), lambda d, i: (i, 0)) for x in xs]
        + [pl.BlockSpec((None,) + w.shape[1:], lambda d, i: (d, 0, 0)) for w in ws]
        + [pl.BlockSpec((None, 1, G4), lambda d, i: (d, 0, 0))]
    )
    return pl.pallas_call(
        kernel,
        out_shape=jax.ShapeDtypeStruct((2, N, G4), jnp.float32),
        grid_spec=pltpu.PrefetchScalarGridSpec(
            num_scalar_prefetch=0,
            grid=(2, N // bm),
            in_specs=in_specs,
            out_specs=pl.BlockSpec((None, bm, G4), lambda d, i: (d, i, 0)),
        ),
        compiler_params=pltpu.CompilerParams(
            dimension_semantics=("parallel", "parallel")),
    )(*xs, *ws, bias)


# ----------------------------------------------------------------------------
# fused bidirectional LSTM recurrence for one layer.
#   gates_x: (2, S, B, 4H) precomputed x-projection (+bias), dir-major
#   whh    : (2, H, 4H)    direction-stacked recurrent weights (pre-transposed)
#   -> (2, S, B, H) hidden states for both directions, aligned to time t
# grid = (direction, time-chunk); time chunks run in order ("arbitrary"),
# directions are independent ("parallel" -> 2 TCs on v7x).
# ----------------------------------------------------------------------------
def _bilstm_recurrence(gates_x, whh_stacked, T):
    _, S, B, G4 = gates_x.shape
    H = G4 // 4
    nc = S // T

    def kernel(gx_ref, whh_ref, out_ref, h_scr, c_scr):
        d = pl.program_id(0)  # 0 = forward, 1 = backward

        @pl.when(pl.program_id(1) == 0)
        def _():
            h_scr[...] = jnp.zeros_like(h_scr)
            c_scr[...] = jnp.zeros_like(c_scr)

        whh = whh_ref[...]                               # (H, 4H), VMEM-resident

        def step(s, carry):
            h, c = carry
            # forward walks 0..T-1 in the chunk, backward walks T-1..0
            idx = (1 - d) * s + d * (T - 1 - s)
            g = gx_ref[idx] + jnp.dot(h, whh, preferred_element_type=jnp.float32)
            i_g = jax.nn.sigmoid(g[:, 0 * H:1 * H])
            f_g = jax.nn.sigmoid(g[:, 1 * H:2 * H])
            g_g = jnp.tanh(g[:, 2 * H:3 * H])
            o_g = jax.nn.sigmoid(g[:, 3 * H:4 * H])
            c_new = f_g * c + i_g * g_g
            h_new = o_g * jnp.tanh(c_new)
            out_ref[idx] = h_new
            return h_new, c_new

        h_last, c_last = jax.lax.fori_loop(
            0, T, step, (h_scr[...], c_scr[...]), unroll=True)
        h_scr[...] = h_last
        c_scr[...] = c_last

    # forward direction visits chunks 0..nc-1, backward visits nc-1..0
    t_map = lambda d, c: (d, d * (nc - 1) + (1 - 2 * d) * c, 0, 0)

    return pl.pallas_call(
        kernel,
        out_shape=jax.ShapeDtypeStruct((2, S, B, H), jnp.float32),
        grid_spec=pltpu.PrefetchScalarGridSpec(
            num_scalar_prefetch=0,
            grid=(2, nc),
            in_specs=[
                pl.BlockSpec((None, T, B, G4), t_map),            # x-gates chunk
                pl.BlockSpec((None, H, G4), lambda d, c: (d, 0, 0)),  # W_hh^T
            ],
            out_specs=pl.BlockSpec((None, T, B, H), t_map),
            scratch_shapes=[
                pltpu.VMEM((B, H), jnp.float32),   # h state (carried over chunks)
                pltpu.VMEM((B, H), jnp.float32),   # c state
            ],
        ),
        compiler_params=pltpu.CompilerParams(
            dimension_semantics=("parallel", "arbitrary")),
    )(gates_x, whh_stacked)


# ----------------------------------------------------------------------------
# final linear on the time-major flattened activations:
#   logits = fw @ W[:H].T-part + bw @ W[H:].T-part + b   (no concat needed)
# ----------------------------------------------------------------------------
def _linear_projection(xs, ws, bias):
    N = xs[0].shape[0]
    O = ws[0].shape[1]
    bm = _row_block(N)
    n_in = len(xs)

    def kernel(*refs):
        _accum_body(n_in, refs)

    # TODO(synk): for realistic O, pad the output to a multiple of 128 lanes to
    # avoid masked partial stores (kept exact O here for semantic fidelity).
    in_specs = (
        [pl.BlockSpec((bm, x.shape[1]), lambda i: (i, 0)) for x in xs]
        + [pl.BlockSpec(w.shape, lambda i: (0, 0)) for w in ws]
        + [pl.BlockSpec((1, O), lambda i: (0, 0))]
    )
    return pl.pallas_call(
        kernel,
        out_shape=jax.ShapeDtypeStruct((N, O), jnp.float32),
        grid_spec=pltpu.PrefetchScalarGridSpec(
            num_scalar_prefetch=0,
            grid=(N // bm,),
            in_specs=in_specs,
            out_specs=pl.BlockSpec((bm, O), lambda i: (i, 0)),
        ),
        compiler_params=pltpu.CompilerParams(
            dimension_semantics=("parallel",)),
    )(*xs, *ws, bias)


# ----------------------------------------------------------------------------
# Parameter init (deterministic, PyTorch default shapes / init ranges),
# packed into the kernel-friendly direction-stacked layout.
# ----------------------------------------------------------------------------
def init_params(key, n_blstm_layers, input_dim, embed_dim, hidden_dim, output_dim):
    H = hidden_dim
    keys = iter(jax.random.split(key, 8 * n_blstm_layers + 8))
    nxt = lambda: next(keys)

    params = {}
    # nn.Embedding: N(0, 1)
    params["embed"] = jax.random.normal(nxt(), (input_dim, embed_dim), jnp.float32)

    # nn.LSTM: U(-1/sqrt(H), 1/sqrt(H))
    bound = 1.0 / float(H) ** 0.5
    U = lambda shape: jax.random.uniform(nxt(), shape, jnp.float32, -bound, bound)

    layers = []
    for layer in range(n_blstm_layers):
        din = embed_dim if layer == 0 else 2 * H
        dirs = []
        for _ in range(2):                      # fwd, bwd
            w_ih = U((4 * H, din))
            w_hh = U((4 * H, H))
            b_ih = U((4 * H,))
            b_hh = U((4 * H,))
            dirs.append((w_ih, w_hh, b_ih + b_hh))
        (wif, whf, bf), (wib, whb, bb) = dirs

        if layer == 0:
            # single input (embeddings): (2, E, 4H)
            w_in = [jnp.stack([wif.T, wib.T])]
        else:
            # two inputs (prev-layer fwd h, bwd h): split the 2H input columns
            w_in = [jnp.stack([wif.T[:H], wib.T[:H]]),     # applied to fwd h
                    jnp.stack([wif.T[H:], wib.T[H:]])]     # applied to bwd h
        b_in = jnp.stack([bf.reshape(1, -1), bb.reshape(1, -1)])   # (2, 1, 4H)
        whh = jnp.stack([whf.T, whb.T])                            # (2, H, 4H)
        layers.append({"w_in": w_in, "b_in": b_in, "whh": whh})
    params["lstm"] = layers

    # nn.Linear(2H, O): U(-1/sqrt(2H), 1/sqrt(2H)); split into fwd/bwd halves.
    lb = 1.0 / float(2 * H) ** 0.5
    w_lin = jax.random.uniform(nxt(), (output_dim, 2 * H), jnp.float32, -lb, lb)
    b_lin = jax.random.uniform(nxt(), (output_dim,), jnp.float32, -lb, lb)
    params["lin_w"] = [w_lin.T[:H], w_lin.T[H:]]                   # two (H, O)
    params["lin_b"] = b_lin.reshape(1, -1)                         # (1, O)
    return params


# ----------------------------------------------------------------------------
# Forward pass = PyTorch BLSTM_Entity_Recognizer.forward
# ----------------------------------------------------------------------------
def blstm_entity_recognizer(params, x_ids):
    B, S = x_ids.shape
    H = params["lstm"][0]["whh"].shape[1]
    G4 = 4 * H

    B_pad = _round_up(B, 8)          # sublane-dense batch
    T = _time_chunk(S)               # timesteps per grid iteration
    N = S * B_pad                    # time-major flattened token count

    # Embedding lookup (gather stays in plain JAX), time-major layout.
    ids_t = jnp.transpose(x_ids)                         # (S, B)
    emb = jnp.take(params["embed"], ids_t, axis=0)       # (S, B, E)
    if B_pad != B:
        emb = jnp.pad(emb, ((0, 0), (0, B_pad - B), (0, 0)))

    xs = [emb.reshape(N, emb.shape[-1])]                 # layer-0 input
    for lp in params["lstm"]:
        gates = _gate_projection(xs, lp["w_in"], lp["b_in"], G4)   # (2, N, 4H)
        h_dirs = _bilstm_recurrence(
            gates.reshape(2, S, B_pad, G4), lp["whh"], T)          # (2, S, Bp, H)
        # next layer consumes the two direction slabs separately (no concat)
        xs = [h_dirs[0].reshape(N, H), h_dirs[1].reshape(N, H)]

    logits = _linear_projection(xs, params["lin_w"], params["lin_b"])  # (N, O)
    O = logits.shape[-1]
    logits = logits.reshape(S, B_pad, O)[:, :B]           # drop batch padding
    return jnp.transpose(logits, (1, 0, 2))               # (B, S, O)


if __name__ == "__main__":
    n_blstm_layers = 2
    input_dim = 50      # vocab size
    embed_dim = 32
    hidden_dim = 32
    output_dim = 8
    B, S = 2, 8

    key = jax.random.PRNGKey(0)
    pkey, xkey = jax.random.split(key)
    params = init_params(pkey, n_blstm_layers, input_dim,
                         embed_dim, hidden_dim, output_dim)
    x = jax.random.randint(xkey, (B, S), 0, input_dim, dtype=jnp.int32)

    logits = jax.jit(blstm_entity_recognizer)(params, x)
    jax.block_until_ready(logits)
    assert logits.shape == (B, S, output_dim)
    assert bool(jnp.all(jnp.isfinite(logits)))
    print("KERNEL_OK")
</pallas_src>

<mosaic_0001>
module attributes {stable_mosaic.version = 11 : i64} {
  func.func @kernel(%arg0: i32, %arg1: i32, %arg2: memref<64x32xf32, #tpu.memory_space<vmem>>, %arg3: memref<1x32x128xf32, #tpu.memory_space<vmem>>, %arg4: memref<1x1x128xf32, #tpu.memory_space<vmem>>, %arg5: memref<1x64x128xf32, #tpu.memory_space<vmem>>) attributes {dimension_semantics = [#tpu.dimension_semantics<parallel>, #tpu.dimension_semantics<parallel>], iteration_bounds = array<i64: 2, 1>, scalar_prefetch = 0 : i64, scratch_operands = 0 : i64, tpu.core_type = #tpu.core_type<tc>, window_params = [{transform_indices = @transform_0, window_bounds = array<i64: 64, 32>}, {transform_indices = @transform_1, window_bounds = array<i64: 1, 32, 128>}, {transform_indices = @transform_2, window_bounds = array<i64: 1, 1, 128>}, {transform_indices = @transform_3, window_bounds = array<i64: 1, 64, 128>}]} {
    %c0 = arith.constant 0 : index
    %c0_0 = arith.constant 0 : index
    %0 = vector.load %arg2[%c0, %c0_0] : memref<64x32xf32, #tpu.memory_space<vmem>>, vector<64x32xf32>
    %c0_1 = arith.constant 0 : index
    %c0_2 = arith.constant 0 : index
    %c0_3 = arith.constant 0 : index
    %1 = vector.load %arg3[%c0_1, %c0_2, %c0_3] : memref<1x32x128xf32, #tpu.memory_space<vmem>>, vector<1x32x128xf32>
    %2 = vector.shape_cast %1 : vector<1x32x128xf32> to vector<32x128xf32>
    %cst = arith.constant dense<0.000000e+00> : vector<64x128xf32>
    %3 = tpu.matmul %0, %2, %cst {dimension_numbers = #tpu.dot_dimension_numbers<[1], [0], [0], [1], [0, 0, 1, 1], [], []>} : vector<64x32xf32>, vector<32x128xf32>, vector<64x128xf32> -> vector<64x128xf32>
    %c0_4 = arith.constant 0 : index
    %c0_5 = arith.constant 0 : index
    %c0_6 = arith.constant 0 : index
    %4 = vector.load %arg4[%c0_4, %c0_5, %c0_6] : memref<1x1x128xf32, #tpu.memory_space<vmem>>, vector<1x1x128xf32>
    %5 = vector.shape_cast %4 : vector<1x1x128xf32> to vector<1x128xf32>
    %6 = vector.broadcast %5 : vector<1x128xf32> to vector<64x128xf32>
    %7 = arith.addf %3, %6 : vector<64x128xf32>
    %c0_7 = arith.constant 0 : index
    %c0_8 = arith.constant 0 : index
    %c0_9 = arith.constant 0 : index
    %8 = vector.load %arg5[%c0_7, %c0_8, %c0_9] : memref<1x64x128xf32, #tpu.memory_space<vmem>>, vector<1x64x128xf32>
    %9 = vector.shape_cast %8 : vector<1x64x128xf32> to vector<64x128xf32>
    %10 = vector.shape_cast %7 : vector<64x128xf32> to vector<1x64x128xf32>
    tpu.vector_store %arg5[%c0_7, %c0_8, %c0_9], %10 {strides = array<i32>} : memref<1x64x128xf32, #tpu.memory_space<vmem>>, vector<1x64x128xf32>,
    return
  }
  func.func @transform_0(%arg0: i32, %arg1: i32) -> (i32, i32) {
    %c0_i32 = arith.constant 0 : i32
    %c0_i32_0 = arith.constant 0 : i32
    return %arg1, %c0_i32 : i32, i32
  }
  func.func @transform_1(%arg0: i32, %arg1: i32) -> (i32, i32, i32) {
    %c0_i32 = arith.constant 0 : i32
    %c0_i32_0 = arith.constant 0 : i32
    %c0_i32_1 = arith.constant 0 : i32
    return %arg0, %c0_i32, %c0_i32_0 : i32, i32, i32
  }
  func.func @transform_2(%arg0: i32, %arg1: i32) -> (i32, i32, i32) {
    %c0_i32 = arith.constant 0 : i32
    %c0_i32_0 = arith.constant 0 : i32
    %c0_i32_1 = arith.constant 0 : i32
    return %arg0, %c0_i32, %c0_i32_0 : i32, i32, i32
  }
  func.func @transform_3(%arg0: i32, %arg1: i32) -> (i32, i32, i32) {
    %c0_i32 = arith.constant 0 : i32
    %c0_i32_0 = arith.constant 0 : i32
    return %arg0, %arg1, %c0_i32 : i32, i32, i32
  }
}

module attributes {stable_mosaic.version = 11 : i64} {
  func.func @kernel(%arg0: i32, %arg1: i32, %arg2: memref<64x32xf32, #tpu.memory_space<vmem>>, %arg3: memref<64x32xf32, #tpu.memory_space<vmem>>, %arg4: memref<1x32x128xf32, #tpu.memory_space<vmem>>, %arg5: memref<1x32x128xf32, #tpu.memory_space<vmem>>, %arg6: memref<1x1x128xf32, #tpu.memory_space<vmem>>, %arg7: memref<1x64x128xf32, #tpu.memory_space<vmem>>) attributes {dimension_semantics = [#tpu.dimension_semantics<parallel>, #tpu.dimension_semantics<parallel>], iteration_bounds = array<i64: 2, 1>, scalar_prefetch = 0 : i64, scratch_operands = 0 : i64, tpu.core_type = #tpu.core_type<tc>, window_params = [{transform_indices = @transform_0, window_bounds = array<i64: 64, 32>}, {transform_indices = @transform_1, window_bounds = array<i64: 64, 32>}, {transform_indices = @transform_2, window_bounds = array<i64: 1, 32, 128>}, {transform_indices = @transform_3, window_bounds = array<i64: 1, 32, 128>}, {transform_indices = @transform_4, window_bounds = array<i64: 1, 1, 128>}, {transform_indices = @transform_5, window_bounds = array<i64: 1, 64, 128>}]} {
    %c0 = arith.constant 0 : index
    %c0_0 = arith.constant 0 : index
    %0 = vector.load %arg2[%c0, %c0_0] : memref<64x32xf32, #tpu.memory_space<vmem>>, vector<64x32xf32>
    %c0_1 = arith.constant 0 : index
    %c0_2 = arith.constant 0 : index
    %c0_3 = arith.constant 0 : index
    %1 = vector.load %arg4[%c0_1, %c0_2, %c0_3] : memref<1x32x128xf32, #tpu.memory_space<vmem>>, vector<1x32x128xf32>
    %2 = vector.shape_cast %1 : vector<1x32x128xf32> to vector<32x128xf32>
    %cst = arith.constant dense<0.000000e+00> : vector<64x128xf32>
    %3 = tpu.matmul %0, %2, %cst {dimension_numbers = #tpu.dot_dimension_numbers<[1], [0], [0], [1], [0, 0, 1, 1], [], []>} : vector<64x32xf32>, vector<32x128xf32>, vector<64x128xf32> -> vector<64x128xf32>
    %c0_4 = arith.constant 0 : index
    %c0_5 = arith.constant 0 : index
    %4 = vector.load %arg3[%c0_4, %c0_5] : memref<64x32xf32, #tpu.memory_space<vmem>>, vector<64x32xf32>
    %c0_6 = arith.constant 0 : index
    %c0_7 = arith.constant 0 : index
    %c0_8 = arith.constant 0 : index
    %5 = vector.load %arg5[%c0_6, %c0_7, %c0_8] : memref<1x32x128xf32, #tpu.memory_space<vmem>>, vector<1x32x128xf32>
    %6 = vector.shape_cast %5 : vector<1x32x128xf32> to vector<32x128xf32>
    %cst_9 = arith.constant dense<0.000000e+00> : vector<64x128xf32>
    %7 = tpu.matmul %4, %6, %cst_9 {dimension_numbers = #tpu.dot_dimension_numbers<[1], [0], [0], [1], [0, 0, 1, 1], [], []>} : vector<64x32xf32>, vector<32x128xf32>, vector<64x128xf32> -> vector<64x128xf32>
    %8 = arith.addf %3, %7 : vector<64x128xf32>
    %c0_10 = arith.constant 0 : index
    %c0_11 = arith.constant 0 : index
    %c0_12 = arith.constant 0 : index
    %9 = vector.load %arg6[%c0_10, %c0_11, %c0_12] : memref<1x1x128xf32, #tpu.memory_space<vmem>>, vector<1x1x128xf32>
    %10 = vector.shape_cast %9 : vector<1x1x128xf32> to vector<1x128xf32>
    %11 = vector.broadcast %10 : vector<1x128xf32> to vector<64x128xf32>
    %12 = arith.addf %8, %11 : vector<64x128xf32>
    %c0_13 = arith.constant 0 : index
    %c0_14 = arith.constant 0 : index
    %c0_15 = arith.constant 0 : index
    %13 = vector.load %arg7[%c0_13, %c0_14, %c0_15] : memref<1x64x128xf32, #tpu.memory_space<vmem>>, vector<1x64x128xf32>
    %14 = vector.shape_cast %13 : vector<1x64x128xf32> to vector<64x128xf32>
    %15 = vector.shape_cast %12 : vector<64x128xf32> to vector<1x64x128xf32>
    tpu.vector_store %arg7[%c0_13, %c0_14, %c0_15], %15 {strides = array<i32>} : memref<1x64x128xf32, #tpu.memory_space<vmem>>, vector<1x64x128xf32>,
    return
  }
  func.func @transform_0(%arg0: i32, %arg1: i32) -> (i32, i32) {
    %c0_i32 = arith.constant 0 : i32
    %c0_i32_0 = arith.constant 0 : i32
    return %arg1, %c0_i32 : i32, i32
  }
  func.func @transform_1(%arg0: i32, %arg1: i32) -> (i32, i32) {
    %c0_i32 = arith.constant 0 : i32
    %c0_i32_0 = arith.constant 0 : i32
    return %arg1, %c0_i32 : i32, i32
  }
  func.func @transform_2(%arg0: i32, %arg1: i32) -> (i32, i32, i32) {
    %c0_i32 = arith.constant 0 : i32
    %c0_i32_0 = arith.constant 0 : i32
    %c0_i32_1 = arith.constant 0 : i32
    return %arg0, %c0_i32, %c0_i32_0 : i32, i32, i32
  }
  func.func @transform_3(%arg0: i32, %arg1: i32) -> (i32, i32, i32) {
    %c0_i32 = arith.constant 0 : i32
    %c0_i32_0 = arith.constant 0 : i32
    %c0_i32_1 = arith.constant 0 : i32
    return %arg0, %c0_i32, %c0_i32_0 : i32, i32, i32
  }
  func.func @transform_4(%arg0: i32, %arg1: i32) -> (i32, i32, i32) {
    %c0_i32 = arith.constant 0 : i32
    %c0_i32_0 = arith.constant 0 : i32
    %c0_i32_1 = arith.constant 0 : i32
    return %arg0, %c0_i32, %c0_i32_0 : i32, i32, i32
  }
  func.func @transform_5(%arg0: i32, %arg1: i32) -> (i32, i32, i32) {
    %c0_i32 = arith.constant 0 : i32
    %c0_i32_0 = arith.constant 0 : i32
    return %arg0, %arg1, %c0_i32 : i32, i32, i32
  }
}

module attributes {stable_mosaic.version = 11 : i64} {
  func.func @kernel(%arg0: i32, %arg1: i32, %arg2: memref<1x8x8x128xf32, #tpu.memory_space<vmem>>, %arg3: memref<1x32x128xf32, #tpu.memory_space<vmem>>, %arg4: memref<1x8x8x32xf32, #tpu.memory_space<vmem>>, %arg5: memref<8x32xf32, #tpu.memory_space<vmem>>, %arg6: memref<8x32xf32, #tpu.memory_space<vmem>>) attributes {dimension_semantics = [#tpu.dimension_semantics<parallel>, #tpu.dimension_semantics<arbitrary>], iteration_bounds = array<i64: 2, 1>, scalar_prefetch = 0 : i64, scratch_operands = 2 : i64, tpu.core_type = #tpu.core_type<tc>, window_params = [{transform_indices = @transform_0, window_bounds = array<i64: 1, 8, 8, 128>}, {transform_indices = @transform_1, window_bounds = array<i64: 1, 32, 128>}, {transform_indices = @transform_2, window_bounds = array<i64: 1, 8, 8, 32>}]} {
    %c0_i32 = arith.constant 0 : i32
    %0 = arith.cmpi eq, %arg1, %c0_i32 : i32
    %1 = arith.extui %0 : i1 to i32
    %c0_i32_0 = arith.constant 0 : i32
    %2 = arith.cmpi ne, %1, %c0_i32_0 : i32
    scf.if %2 {
      %cst_107 = arith.constant 0.000000e+00 : f32
      %321 = vector.broadcast %cst_107 : f32 to vector<8x32xf32>
      %c0_108 = arith.constant 0 : index
      %c0_109 = arith.constant 0 : index
      %322 = vector.load %arg5[%c0_108, %c0_109] : memref<8x32xf32, #tpu.memory_space<vmem>>, vector<8x32xf32>
      tpu.vector_store %arg5[%c0_108, %c0_109], %321 {strides = array<i32>} : memref<8x32xf32, #tpu.memory_space<vmem>>, vector<8x32xf32>,
      %cst_110 = arith.constant 0.000000e+00 : f32
      %323 = vector.broadcast %cst_110 : f32 to vector<8x32xf32>
      %c0_111 = arith.constant 0 : index
      %c0_112 = arith.constant 0 : index
      %324 = vector.load %arg6[%c0_111, %c0_112] : memref<8x32xf32, #tpu.memory_space<vmem>>, vector<8x32xf32>
      tpu.vector_store %arg6[%c0_111, %c0_112], %323 {strides = array<i32>} : memref<8x32xf32, #tpu.memory_space<vmem>>, vector<8x32xf32>,
    } else {
    }
    %c0 = arith.constant 0 : index
    %c0_1 = arith.constant 0 : index
    %c0_2 = arith.constant 0 : index
    %3 = vector.load %arg3[%c0, %c0_1, %c0_2] : memref<1x32x128xf32, #tpu.memory_space<vmem>>, vector<1x32x128xf32>
    %4 = vector.shape_cast %3 : vector<1x32x128xf32> to vector<32x128xf32>
    %c0_3 = arith.constant 0 : index
    %c0_4 = arith.constant 0 : index
    %5 = vector.load %arg5[%c0_3, %c0_4] : memref<8x32xf32, #tpu.memory_space<vmem>>, vector<8x32xf32>
    %c0_5 = arith.constant 0 : index
    %c0_6 = arith.constant 0 : index
    %6 = vector.load %arg6[%c0_5, %c0_6] : memref<8x32xf32, #tpu.memory_space<vmem>>, vector<8x32xf32>
    %c0_i32_7 = arith.constant 0 : i32
    %c1_i32 = arith.constant 1 : i32
    %7 = arith.subi %c1_i32, %arg0 : i32
    %8 = arith.muli %7, %c0_i32_7 : i32
    %c7_i32 = arith.constant 7 : i32
    %9 = arith.subi %c7_i32, %c0_i32_7 : i32
    %10 = arith.muli %arg0, %9 : i32
    %11 = arith.addi %8, %10 : i32
    %c0_8 = arith.constant 0 : index
    %12 = arith.index_cast %11 : i32 to index
    %c0_9 = arith.constant 0 : index
    %c0_10 = arith.constant 0 : index
    %13 = vector.load %arg2[%c0_8, %12, %c0_9, %c0_10] : memref<1x8x8x128xf32, #tpu.memory_space<vmem>>, vector<1x1x8x128xf32>
    %14 = vector.shape_cast %13 : vector<1x1x8x128xf32> to vector<8x128xf32>
    %cst = arith.constant dense<0.000000e+00> : vector<8x128xf32>
    %15 = tpu.matmul %5, %4, %cst {dimension_numbers = #tpu.dot_dimension_numbers<[1], [0], [0], [1], [0, 0, 1, 1], [], []>} : vector<8x32xf32>, vector<32x128xf32>, vector<8x128xf32> -> vector<8x128xf32>
    %16 = arith.addf %14, %15 : vector<8x128xf32>
    %17 = vector.extract_strided_slice %16 {offsets = [0, 0], sizes = [8, 32], strides = [1, 1]} : vector<8x128xf32> to vector<8x32xf32>
    %18 = arith.negf %17 : vector<8x32xf32>
    %19 = math.exp %18 : vector<8x32xf32>
    %cst_11 = arith.constant 1.000000e+00 : f32
    %20 = vector.broadcast %cst_11 : f32 to vector<8x32xf32>
    %21 = arith.addf %20, %19 : vector<8x32xf32>
    %22 = arith.divf %20, %21 : vector<8x32xf32>
    %23 = vector.extract_strided_slice %16 {offsets = [0, 32], sizes = [8, 32], strides = [1, 1]} : vector<8x128xf32> to vector<8x32xf32>
    %24 = arith.negf %23 : vector<8x32xf32>
    %25 = math.exp %24 : vector<8x32xf32>
    %cst_12 = arith.constant 1.000000e+00 : f32
    %26 = vector.broadcast %cst_12 : f32 to vector<8x32xf32>
    %27 = arith.addf %26, %25 : vector<8x32xf32>
    %28 = arith.divf %26, %27 : vector<8x32xf32>
    %29 = vector.extract_strided_slice %16 {offsets = [0, 64], sizes = [8, 32], strides = [1, 1]} : vector<8x128xf32> to vector<8x32xf32>
    %30 = math.tanh %29 : vector<8x32xf32>
    %31 = vector.extract_strided_slice %16 {offsets = [0, 96], sizes = [8, 32], strides = [1, 1]} : vector<8x128xf32> to vector<8x32xf32>
    %32 = arith.negf %31 : vector<8x32xf32>
    %33 = math.exp %32 : vector<8x32xf32>
    %cst_13 = arith.constant 1.000000e+00 : f32
    %34 = vector.broadcast %cst_13 : f32 to vector<8x32xf32>
    %35 = arith.addf %34, %33 : vector<8x32xf32>
    %36 = arith.divf %34, %35 : vector<8x32xf32>
    %37 = arith.mulf %28, %6 : vector<8x32xf32>
    %38 = arith.mulf %22, %30 : vector<8x32xf32>
    %39 = arith.addf %37, %38 : vector<8x32xf32>
    %40 = math.tanh %39 : vector<8x32xf32>
    %41 = arith.mulf %36, %40 : vector<8x32xf32>
    %c0_14 = arith.constant 0 : index
    %42 = arith.index_cast %11 : i32 to index
    %c0_15 = arith.constant 0 : index
    %c0_16 = arith.constant 0 : index
    %43 = vector.load %arg4[%c0_14, %42, %c0_15, %c0_16] : memref<1x8x8x32xf32, #tpu.memory_space<vmem>>, vector<1x1x8x32xf32>
    %44 = vector.shape_cast %43 : vector<1x1x8x32xf32> to vector<8x32xf32>
    %45 = vector.shape_cast %41 : vector<8x32xf32> to vector<1x1x8x32xf32>
    tpu.vector_store %arg4[%c0_14, %42, %c0_15, %c0_16], %45 {strides = array<i32>} : memref<1x8x8x32xf32, #tpu.memory_space<vmem>>, vector<1x1x8x32xf32>,
    %c1_i32_17 = arith.constant 1 : i32
    %c1_i32_18 = arith.constant 1 : i32
    %46 = arith.subi %c1_i32_18, %arg0 : i32
    %47 = arith.muli %46, %c1_i32_17 : i32
    %c7_i32_19 = arith.constant 7 : i32
    %48 = arith.subi %c7_i32_19, %c1_i32_17 : i32
    %49 = arith.muli %arg0, %48 : i32
    %50 = arith.addi %47, %49 : i32
    %c0_20 = arith.constant 0 : index
    %51 = arith.index_cast %50 : i32 to index
    %c0_21 = arith.constant 0 : index
    %c0_22 = arith.constant 0 : index
    %52 = vector.load %arg2[%c0_20, %51, %c0_21, %c0_22] : memref<1x8x8x128xf32, #tpu.memory_space<vmem>>, vector<1x1x8x128xf32>
    %53 = vector.shape_cast %52 : vector<1x1x8x128xf32> to vector<8x128xf32>
    %cst_23 = arith.constant dense<0.000000e+00> : vector<8x128xf32>
    %54 = tpu.matmul %41, %4, %cst_23 {dimension_numbers = #tpu.dot_dimension_numbers<[1], [0], [0], [1], [0, 0, 1, 1], [], []>} : vector<8x32xf32>, vector<32x128xf32>, vector<8x128xf32> -> vector<8x128xf32>
    %55 = arith.addf %53, %54 : vector<8x128xf32>
    %56 = vector.extract_strided_slice %55 {offsets = [0, 0], sizes = [8, 32], strides = [1, 1]} : vector<8x128xf32> to vector<8x32xf32>
    %57 = arith.negf %56 : vector<8x32xf32>
    %58 = math.exp %57 : vector<8x32xf32>
    %cst_24 = arith.constant 1.000000e+00 : f32
    %59 = vector.broadcast %cst_24 : f32 to vector<8x32xf32>
    %60 = arith.addf %59, %58 : vector<8x32xf32>
    %61 = arith.divf %59, %60 : vector<8x32xf32>
    %62 = vector.extract_strided_slice %55 {offsets = [0, 32], sizes = [8, 32], strides = [1, 1]} : vector<8x128xf32> to vector<8x32xf32>
    %63 = arith.negf %62 : vector<8x32xf32>
    %64 = math.exp %63 : vector<8x32xf32>
    %cst_25 = arith.constant 1.000000e+00 : f32
    %65 = vector.broadcast %cst_25 : f32 to vector<8x32xf32>
    %66 = arith.addf %65, %64 : vector<8x32xf32>
    %67 = arith.divf %65, %66 : vector<8x32xf32>
    %68 = vector.extract_strided_slice %55 {offsets = [0, 64], sizes = [8, 32], strides = [1, 1]} : vector<8x128xf32> to vector<8x32xf32>
    %69 = math.tanh %68 : vector<8x32xf32>
    %70 = vector.extract_strided_slice %55 {offsets = [0, 96], sizes = [8, 32], strides = [1, 1]} : vector<8x128xf32> to vector<8x32xf32>
    %71 = arith.negf %70 : vector<8x32xf32>
    %72 = math.exp %71 : vector<8x32xf32>
    %cst_26 = arith.constant 1.000000e+00 : f32
    %73 = vector.broadcast %cst_26 : f32 to vector<8x32xf32>
    %74 = arith.addf %73, %72 : vector<8x32xf32>
    %75 = arith.divf %73, %74 : vector<8x32xf32>
    %76 = arith.mulf %67, %39 : vector<8x32xf32>
    %77 = arith.mulf %61, %69 : vector<8x32xf32>
    %78 = arith.addf %76, %77 : vector<8x32xf32>
    %79 = math.tanh %78 : vector<8x32xf32>
    %80 = arith.mulf %75, %79 : vector<8x32xf32>
    %c0_27 = arith.constant 0 : index
    %81 = arith.index_cast %50 : i32 to index
    %c0_28 = arith.constant 0 : index
    %c0_29 = arith.constant 0 : index
    %82 = vector.load %arg4[%c0_27, %81, %c0_28, %c0_29] : memref<1x8x8x32xf32, #tpu.memory_space<vmem>>, vector<1x1x8x32xf32>
    %83 = vector.shape_cast %82 : vector<1x1x8x32xf32> to vector<8x32xf32>
    %84 = vector.shape_cast %80 : vector<8x32xf32> to vector<1x1x8x32xf32>
    tpu.vector_store %arg4[%c0_27, %81, %c0_28, %c0_29], %84 {strides = array<i32>} : memref<1x8x8x32xf32, #tpu.memory_space<vmem>>, vector<1x1x8x32xf32>,
    %c2_i32 = arith.constant 2 : i32
    %c1_i32_30 = arith.constant 1 : i32
    %85 = arith.subi %c1_i32_30, %arg0 : i32
    %86 = arith.muli %85, %c2_i32 : i32
    %c7_i32_31 = arith.constant 7 : i32
    %87 = arith.subi %c7_i32_31, %c2_i32 : i32
    %88 = arith.muli %arg0, %87 : i32
    %89 = arith.addi %86, %88 : i32
    %c0_32 = arith.constant 0 : index
    %90 = arith.index_cast %89 : i32 to index
    %c0_33 = arith.constant 0 : index
    %c0_34 = arith.constant 0 : index
    %91 = vector.load %arg2[%c0_32, %90, %c0_33, %c0_34] : memref<1x8x8x128xf32, #tpu.memory_space<vmem>>, vector<1x1x8x128xf32>
    %92 = vector.shape_cast %91 : vector<1x1x8x128xf32> to vector<8x128xf32>
    %cst_35 = arith.constant dense<0.000000e+00> : vector<8x128xf32>
    %93 = tpu.matmul %80, %4, %cst_35 {dimension_numbers = #tpu.dot_dimension_numbers<[1], [0], [0], [1], [0, 0, 1, 1], [], []>} : vector<8x32xf32>, vector<32x128xf32>, vector<8x128xf32> -> vector<8x128xf32>
    %94 = arith.addf %92, %93 : vector<8x128xf32>
    %95 = vector.extract_strided_slice %94 {offsets = [0, 0], sizes = [8, 32], strides = [1, 1]} : vector<8x128xf32> to vector<8x32xf32>
    %96 = arith.negf %95 : vector<8x32xf32>
    %97 = math.exp %96 : vector<8x32xf32>
    %cst_36 = arith.constant 1.000000e+00 : f32
    %98 = vector.broadcast %cst_36 : f32 to vector<8x32xf32>
    %99 = arith.addf %98, %97 : vector<8x32xf32>
    %100 = arith.divf %98, %99 : vector<8x32xf32>
    %101 = vector.extract_strided_slice %94 {offsets = [0, 32], sizes = [8, 32], strides = [1, 1]} : vector<8x128xf32> to vector<8x32xf32>
    %102 = arith.negf %101 : vector<8x32xf32>
    %103 = math.exp %102 : vector<8x32xf32>
    %cst_37 = arith.constant 1.000000e+00 : f32
    %104 = vector.broadcast %cst_37 : f32 to vector<8x32xf32>
    %105 = arith.addf %104, %103 : vector<8x32xf32>
    %106 = arith.divf %104, %105 : vector<8x32xf32>
    %107 = vector.extract_strided_slice %94 {offsets = [0, 64], sizes = [8, 32], strides = [1, 1]} : vector<8x128xf32> to vector<8x32xf32>
    %108 = math.tanh %107 : vector<8x32xf32>
    %109 = vector.extract_strided_slice %94 {offsets = [0, 96], sizes = [8, 32], strides = [1, 1]} : vector<8x128xf32> to vector<8x32xf32>
    %110 = arith.negf %109 : vector<8x32xf32>
    %111 = math.exp %110 : vector<8x32xf32>
    %cst_38 = arith.constant 1.000000e+00 : f32
    %112 = vector.broadcast %cst_38 : f32 to vector<8x32xf32>
    %113 = arith.addf %112, %111 : vector<8x32xf32>
    %114 = arith.divf %112, %113 : vector<8x32xf32>
    %115 = arith.mulf %106, %78 : vector<8x32xf32>
    %116 = arith.mulf %100, %108 : vector<8x32xf32>
    %117 = arith.addf %115, %116 : vector<8x32xf32>
    %118 = math.tanh %117 : vector<8x32xf32>
    %119 = arith.mulf %114, %118 : vector<8x32xf32>
    %c0_39 = arith.constant 0 : index
    %120 = arith.index_cast %89 : i32 to index
    %c0_40 = arith.constant 0 : index
    %c0_41 = arith.constant 0 : index
    %121 = vector.load %arg4[%c0_39, %120, %c0_40, %c0_41] : memref<1x8x8x32xf32, #tpu.memory_space<vmem>>, vector<1x1x8x32xf32>
    %122 = vector.shape_cast %121 : vector<1x1x8x32xf32> to vector<8x32xf32>
    %123 = vector.shape_cast %119 : vector<8x32xf32> to vector<1x1x8x32xf32>
    tpu.vector_store %arg4[%c0_39, %120, %c0_40, %c0_41], %123 {strides = array<i32>} : memref<1x8x8x32xf32, #tpu.memory_space<vmem>>, vector<1x1x8x32xf32>,
    %c3_i32 = arith.constant 3 : i32
    %c1_i32_42 = arith.constant 1 : i32
    %124 = arith.subi %c1_i32_42, %arg0 : i32
    %125 = arith.muli %124, %c3_i32 : i32
    %c7_i32_43 = arith.constant 7 : i32
    %126 = arith.subi %c7_i32_43, %c3_i32 : i32
    %127 = arith.muli %arg0, %126 : i32
    %128 = arith.addi %125, %127 : i32
    %c0_44 = arith.constant 0 : index
    %129 = arith.index_cast %128 : i32 to index
    %c0_45 = arith.constant 0 : index
    %c0_46 = arith.constant 0 : index
    %130 = vector.load %arg2[%c0_44, %129, %c0_45, %c0_46] : memref<1x8x8x128xf32, #tpu.memory_space<vmem>>, vector<1x1x8x128xf32>
    %131 = vector.shape_cast %130 : vector<1x1x8x128xf32> to vector<8x128xf32>
    %cst_47 = arith.constant dense<0.000000e+00> : vector<8x128xf32>
    %132 = tpu.matmul %119, %4, %cst_47 {dimension_numbers = #tpu.dot_dimension_numbers<[1], [0], [0], [1], [0, 0, 1, 1], [], []>} : vector<8x32xf32>, vector<32x128xf32>, vector<8x128xf32> -> vector<8x128xf32>
    %133 = arith.addf %131, %132 : vector<8x128xf32>
    %134 = vector.extract_strided_slice %133 {offsets = [0, 0], sizes = [8, 32], strides = [1, 1]} : vector<8x128xf32> to vector<8x32xf32>
    %135 = arith.negf %134 : vector<8x32xf32>
    %136 = math.exp %135 : vector<8x32xf32>
    %cst_48 = arith.constant 1.000000e+00 : f32
    %137 = vector.broadcast %cst_48 : f32 to vector<8x32xf32>
    %138 = arith.addf %137, %136 : vector<8x32xf32>
    %139 = arith.divf %137, %138 : vector<8x32xf32>
    %140 = vector.extract_strided_slice %133 {offsets = [0, 32], sizes = [8, 32], strides = [1, 1]} : vector<8x128xf32> to vector<8x32xf32>
    %141 = arith.negf %140 : vector<8x32xf32>
    %142 = math.exp %141 : vector<8x32xf32>
    %cst_49 = arith.constant 1.000000e+00 : f32
    %143 = vector.broadcast %cst_49 : f32 to vector<8x32xf32>
    %144 = arith.addf %143, %142 : vector<8x32xf32>
    %145 = arith.divf %143, %144 : vector<8x32xf32>
    %146 = vector.extract_strided_slice %133 {offsets = [0, 64], sizes = [8, 32], strides = [1, 1]} : vector<8x128xf32> to vector<8x32xf32>
    %147 = math.tanh %146 : vector<8x32xf32>
    %148 = vector.extract_strided_slice %133 {offsets = [0, 96], sizes = [8, 32], strides = [1, 1]} : vector<8x128xf32> to vector<8x32xf32>
    %149 = arith.negf %148 : vector<8x32xf32>
    %150 = math.exp %149 : vector<8x32xf32>
    %cst_50 = arith.constant 1.000000e+00 : f32
    %151 = vector.broadcast %cst_50 : f32 to vector<8x32xf32>
    %152 = arith.addf %151, %150 : vector<8x32xf32>
    %153 = arith.divf %151, %152 : vector<8x32xf32>
    %154 = arith.mulf %145, %117 : vector<8x32xf32>
    %155 = arith.mulf %139, %147 : vector<8x32xf32>
    %156 = arith.addf %154, %155 : vector<8x32xf32>
    %157 = math.tanh %156 : vector<8x32xf32>
    %158 = arith.mulf %153, %157 : vector<8x32xf32>
    %c0_51 = arith.constant 0 : index
    %159 = arith.index_cast %128 : i32 to index
    %c0_52 = arith.constant 0 : index
    %c0_53 = arith.constant 0 : index
    %160 = vector.load %arg4[%c0_51, %159, %c0_52, %c0_53] : memref<1x8x8x32xf32, #tpu.memory_space<vmem>>, vector<1x1x8x32xf32>
    %161 = vector.shape_cast %160 : vector<1x1x8x32xf32> to vector<8x32xf32>
    %162 = vector.shape_cast %158 : vector<8x32xf32> to vector<1x1x8x32xf32>
    tpu.vector_store %arg4[%c0_51, %159, %c0_52, %c0_53], %162 {strides = array<i32>} : memref<1x8x8x32xf32, #tpu.memory_space<vmem>>, vector<1x1x8x32xf32>,
    %c4_i32 = arith.constant 4 : i32
    %c1_i32_54 = arith.constant 1 : i32
    %163 = arith.subi %c1_i32_54, %arg0 : i32
    %164 = arith.muli %163, %c4_i32 : i32
    %c7_i32_55 = arith.constant 7 : i32
    %165 = arith.subi %c7_i32_55, %c4_i32 : i32
    %166 = arith.muli %arg0, %165 : i32
    %167 = arith.addi %164, %166 : i32
    %c0_56 = arith.constant 0 : index
    %168 = arith.index_cast %167 : i32 to index
    %c0_57 = arith.constant 0 : index
    %c0_58 = arith.constant 0 : index
    %169 = vector.load %arg2[%c0_56, %168, %c0_57, %c0_58] : memref<1x8x8x128xf32, #tpu.memory_space<vmem>>, vector<1x1x8x128xf32>
    %170 = vector.shape_cast %169 : vector<1x1x8x128xf32> to vector<8x128xf32>
    %cst_59 = arith.constant dense<0.000000e+00> : vector<8x128xf32>
    %171 = tpu.matmul %158, %4, %cst_59 {dimension_numbers = #tpu.dot_dimension_numbers<[1], [0], [0], [1], [0, 0, 1, 1], [], []>} : vector<8x32xf32>, vector<32x128xf32>, vector<8x128xf32> -> vector<8x128xf32>
    %172 = arith.addf %170, %171 : vector<8x128xf32>
    %173 = vector.extract_strided_slice %172 {offsets = [0, 0], sizes = [8, 32], strides = [1, 1]} : vector<8x128xf32> to vector<8x32xf32>
    %174 = arith.negf %173 : vector<8x32xf32>
    %175 = math.exp %174 : vector<8x32xf32>
    %cst_60 = arith.constant 1.000000e+00 : f32
    %176 = vector.broadcast %cst_60 : f32 to vector<8x32xf32>
    %177 = arith.addf %176, %175 : vector<8x32xf32>
    %178 = arith.divf %176, %177 : vector<8x32xf32>
    %179 = vector.extract_strided_slice %172 {offsets = [0, 32], sizes = [8, 32], strides = [1, 1]} : vector<8x128xf32> to vector<8x32xf32>
    %180 = arith.negf %179 : vector<8x32xf32>
    %181 = math.exp %180 : vector<8x32xf32>
    %cst_61 = arith.constant 1.000000e+00 : f32
    %182 = vector.broadcast %cst_61 : f32 to vector<8x32xf32>
    %183 = arith.addf %182, %181 : vector<8x32xf32>
    %184 = arith.divf %182, %183 : vector<8x32xf32>
    %185 = vector.extract_strided_slice %172 {offsets = [0, 64], sizes = [8, 32], strides = [1, 1]} : vector<8x128xf32> to vector<8x32xf32>
    %186 = math.tanh %185 : vector<8x32xf32>
    %187 = vector.extract_strided_slice %172 {offsets = [0, 96], sizes = [8, 32], strides = [1, 1]} : vector<8x128xf32> to vector<8x32xf32>
    %188 = arith.negf %187 : vector<8x32xf32>
    %189 = math.exp %188 : vector<8x32xf32>
    %cst_62 = arith.constant 1.000000e+00 : f32
    %190 = vector.broadcast %cst_62 : f32 to vector<8x32xf32>
    %191 = arith.addf %190, %189 : vector<8x32xf32>
    %192 = arith.divf %190, %191 : vector<8x32xf32>
    %193 = arith.mulf %184, %156 : vector<8x32xf32>
    %194 = arith.mulf %178, %186 : vector<8x32xf32>
    %195 = arith.addf %193, %194 : vector<8x32xf32>
    %196 = math.tanh %195 : vector<8x32xf32>
    %197 = arith.mulf %192, %196 : vector<8x32xf32>
    %c0_63 = arith.constant 0 : index
    %198 = arith.index_cast %167 : i32 to index
    %c0_64 = arith.constant 0 : index
    %c0_65 = arith.constant 0 : index
    %199 = vector.load %arg4[%c0_63, %198, %c0_64, %c0_65] : memref<1x8x8x32xf32, #tpu.memory_space<vmem>>, vector<1x1x8x32xf32>
    %200 = vector.shape_cast %199 : vector<1x1x8x32xf32> to vector<8x32xf32>
    %201 = vector.shape_cast %197 : vector<8x32xf32> to vector<1x1x8x32xf32>
    tpu.vector_store %arg4[%c0_63, %198, %c0_64, %c0_65], %201 {strides = array<i32>} : memref<1x8x8x32xf32, #tpu.memory_space<vmem>>, vector<1x1x8x32xf32>,
    %c5_i32 = arith.constant 5 : i32
    %c1_i32_66 = arith.constant 1 : i32
    %202 = arith.subi %c1_i32_66, %arg0 : i32
    %203 = arith.muli %202, %c5_i32 : i32
    %c7_i32_67 = arith.constant 7 : i32
    %204 = arith.subi %c7_i32_67, %c5_i32 : i32
    %205 = arith.muli %arg0, %204 : i32
    %206 = arith.addi %203, %205 : i32
    %c0_68 = arith.constant 0 : index
    %207 = arith.index_cast %206 : i32 to index
    %c0_69 = arith.constant 0 : index
    %c0_70 = arith.constant 0 : index
    %208 = vector.load %arg2[%c0_68, %207, %c0_69, %c0_70] : memref<1x8x8x128xf32, #tpu.memory_space<vmem>>, vector<1x1x8x128xf32>
    %209 = vector.shape_cast %208 : vector<1x1x8x128xf32> to vector<8x128xf32>
    %cst_71 = arith.constant dense<0.000000e+00> : vector<8x128xf32>
    %210 = tpu.matmul %197, %4, %cst_71 {dimension_numbers = #tpu.dot_dimension_numbers<[1], [0], [0], [1], [0, 0, 1, 1], [], []>} : vector<8x32xf32>, vector<32x128xf32>, vector<8x128xf32> -> vector<8x128xf32>
    %211 = arith.addf %209, %210 : vector<8x128xf32>
    %212 = vector.extract_strided_slice %211 {offsets = [0, 0], sizes = [8, 32], strides = [1, 1]} : vector<8x128xf32> to vector<8x32xf32>
    %213 = arith.negf %212 : vector<8x32xf32>
    %214 = math.exp %213 : vector<8x32xf32>
    %cst_72 = arith.constant 1.000000e+00 : f32
    %215 = vector.broadcast %cst_72 : f32 to vector<8x32xf32>
    %216 = arith.addf %215, %214 : vector<8x32xf32>
    %217 = arith.divf %215, %216 : vector<8x32xf32>
    %218 = vector.extract_strided_slice %211 {offsets = [0, 32], sizes = [8, 32], strides = [1, 1]} : vector<8x128xf32> to vector<8x32xf32>
    %219 = arith.negf %218 : vector<8x32xf32>
    %220 = math.exp %219 : vector<8x32xf32>
    %cst_73 = arith.constant 1.000000e+00 : f32
    %221 = vector.broadcast %cst_73 : f32 to vector<8x32xf32>
    %222 = arith.addf %221, %220 : vector<8x32xf32>
    %223 = arith.divf %221, %222 : vector<8x32xf32>
    %224 = vector.extract_strided_slice %211 {offsets = [0, 64], sizes = [8, 32], strides = [1, 1]} : vector<8x128xf32> to vector<8x32xf32>
    %225 = math.tanh %224 : vector<8x32xf32>
    %226 = vector.extract_strided_slice %211 {offsets = [0, 96], sizes = [8, 32], strides = [1, 1]} : vector<8x128xf32> to vector<8x32xf32>
    %227 = arith.negf %226 : vector<8x32xf32>
    %228 = math.exp %227 : vector<8x32xf32>
    %cst_74 = arith.constant 1.000000e+00 : f32
    %229 = vector.broadcast %cst_74 : f32 to vector<8x32xf32>
    %230 = arith.addf %229, %228 : vector<8x32xf32>
    %231 = arith.divf %229, %230 : vector<8x32xf32>
    %232 = arith.mulf %223, %195 : vector<8x32xf32>
    %233 = arith.mulf %217, %225 : vector<8x32xf32>
    %234 = arith.addf %232, %233 : vector<8x32xf32>
    %235 = math.tanh %234 : vector<8x32xf32>
    %236 = arith.mulf %231, %235 : vector<8x32xf32>
    %c0_75 = arith.constant 0 : index
    %237 = arith.index_cast %206 : i32 to index
    %c0_76 = arith.constant 0 : index
    %c0_77 = arith.constant 0 : index
    %238 = vector.load %arg4[%c0_75, %237, %c0_76, %c0_77] : memref<1x8x8x32xf32, #tpu.memory_space<vmem>>, vector<1x1x8x32xf32>
    %239 = vector.shape_cast %238 : vector<1x1x8x32xf32> to vector<8x32xf32>
    %240 = vector.shape_cast %236 : vector<8x32xf32> to vector<1x1x8x32xf32>
    tpu.vector_store %arg4[%c0_75, %237, %c0_76, %c0_77], %240 {strides = array<i32>} : memref<1x8x8x32xf32, #tpu.memory_space<vmem>>, vector<1x1x8x32xf32>,
    %c6_i32 = arith.constant 6 : i32
    %c1_i32_78 = arith.constant 1 : i32
    %241 = arith.subi %c1_i32_78, %arg0 : i32
    %242 = arith.muli %241, %c6_i32 : i32
    %c7_i32_79 = arith.constant 7 : i32
    %243 = arith.subi %c7_i32_79, %c6_i32 : i32
    %244 = arith.muli %arg0, %243 : i32
    %245 = arith.addi %242, %244 : i32
    %c0_80 = arith.constant 0 : index
    %246 = arith.index_cast %245 : i32 to index
    %c0_81 = arith.constant 0 : index
    %c0_82 = arith.constant 0 : index
    %247 = vector.load %arg2[%c0_80, %246, %c0_81, %c0_82] : memref<1x8x8x128xf32, #tpu.memory_space<vmem>>, vector<1x1x8x128xf32>
    %248 = vector.shape_cast %247 : vector<1x1x8x128xf32> to vector<8x128xf32>
    %cst_83 = arith.constant dense<0.000000e+00> : vector<8x128xf32>
    %249 = tpu.matmul %236, %4, %cst_83 {dimension_numbers = #tpu.dot_dimension_numbers<[1], [0], [0], [1], [0, 0, 1, 1], [], []>} : vector<8x32xf32>, vector<32x128xf32>, vector<8x128xf32> -> vector<8x128xf32>
    %250 = arith.addf %248, %249 : vector<8x128xf32>
    %251 = vector.extract_strided_slice %250 {offsets = [0, 0], sizes = [8, 32], strides = [1, 1]} : vector<8x128xf32> to vector<8x32xf32>
    %252 = arith.negf %251 : vector<8x32xf32>
    %253 = math.exp %252 : vector<8x32xf32>
    %cst_84 = arith.constant 1.000000e+00 : f32
    %254 = vector.broadcast %cst_84 : f32 to vector<8x32xf32>
    %255 = arith.addf %254, %253 : vector<8x32xf32>
    %256 = arith.divf %254, %255 : vector<8x32xf32>
    %257 = vector.extract_strided_slice %250 {offsets = [0, 32], sizes = [8, 32], strides = [1, 1]} : vector<8x128xf32> to vector<8x32xf32>
    %258 = arith.negf %257 : vector<8x32xf32>
    %259 = math.exp %258 : vector<8x32xf32>
    %cst_85 = arith.constant 1.000000e+00 : f32
    %260 = vector.broadcast %cst_85 : f32 to vector<8x32xf32>
    %261 = arith.addf %260, %259 : vector<8x32xf32>
    %262 = arith.divf %260, %261 : vector<8x32xf32>
    %263 = vector.extract_strided_slice %250 {offsets = [0, 64], sizes = [8, 32], strides = [1, 1]} : vector<8x128xf32> to vector<8x32xf32>
    %264 = math.tanh %263 : vector<8x32xf32>
    %265 = vector.extract_strided_slice %250 {offsets = [0, 96], sizes = [8, 32], strides = [1, 1]} : vector<8x128xf32> to vector<8x32xf32>
    %266 = arith.negf %265 : vector<8x32xf32>
    %267 = math.exp %266 : vector<8x32xf32>
    %cst_86 = arith.constant 1.000000e+00 : f32
    %268 = vector.broadcast %cst_86 : f32 to vector<8x32xf32>
    %269 = arith.addf %268, %267 : vector<8x32xf32>
    %270 = arith.divf %268, %269 : vector<8x32xf32>
    %271 = arith.mulf %262, %234 : vector<8x32xf32>
    %272 = arith.mulf %256, %264 : vector<8x32xf32>
    %273 = arith.addf %271, %272 : vector<8x32xf32>
    %274 = math.tanh %273 : vector<8x32xf32>
    %275 = arith.mulf %270, %274 : vector<8x32xf32>
    %c0_87 = arith.constant 0 : index
    %276 = arith.index_cast %245 : i32 to index
    %c0_88 = arith.constant 0 : index
    %c0_89 = arith.constant 0 : index
    %277 = vector.load %arg4[%c0_87, %276, %c0_88, %c0_89] : memref<1x8x8x32xf32, #tpu.memory_space<vmem>>, vector<1x1x8x32xf32>
    %278 = vector.shape_cast %277 : vector<1x1x8x32xf32> to vector<8x32xf32>
    %279 = vector.shape_cast %275 : vector<8x32xf32> to vector<1x1x8x32xf32>
    tpu.vector_store %arg4[%c0_87, %276, %c0_88, %c0_89], %279 {strides = array<i32>} : memref<1x8x8x32xf32, #tpu.memory_space<vmem>>, vector<1x1x8x32xf32>,
    %c7_i32_90 = arith.constant 7 : i32
    %c1_i32_91 = arith.constant 1 : i32
    %280 = arith.subi %c1_i32_91, %arg0 : i32
    %281 = arith.muli %280, %c7_i32_90 : i32
    %c7_i32_92 = arith.constant 7 : i32
    %282 = arith.subi %c7_i32_92, %c7_i32_90 : i32
    %283 = arith.muli %arg0, %282 : i32
    %284 = arith.addi %281, %283 : i32
    %c0_93 = arith.constant 0 : index
    %285 = arith.index_cast %284 : i32 to index
    %c0_94 = arith.constant 0 : index
    %c0_95 = arith.constant 0 : index
    %286 = vector.load %arg2[%c0_93, %285, %c0_94, %c0_95] : memref<1x8x8x128xf32, #tpu.memory_space<vmem>>, vector<1x1x8x128xf32>
    %287 = vector.shape_cast %286 : vector<1x1x8x128xf32> to vector<8x128xf32>
    %cst_96 = arith.constant dense<0.000000e+00> : vector<8x128xf32>
    %288 = tpu.matmul %275, %4, %cst_96 {dimension_numbers = #tpu.dot_dimension_numbers<[1], [0], [0], [1], [0, 0, 1, 1], [], []>} : vector<8x32xf32>, vector<32x128xf32>, vector<8x128xf32> -> vector<8x128xf32>
    %289 = arith.addf %287, %288 : vector<8x128xf32>
    %290 = vector.extract_strided_slice %289 {offsets = [0, 0], sizes = [8, 32], strides = [1, 1]} : vector<8x128xf32> to vector<8x32xf32>
    %291 = arith.negf %290 : vector<8x32xf32>
    %292 = math.exp %291 : vector<8x32xf32>
    %cst_97 = arith.constant 1.000000e+00 : f32
    %293 = vector.broadcast %cst_97 : f32 to vector<8x32xf32>
    %294 = arith.addf %293, %292 : vector<8x32xf32>
    %295 = arith.divf %293, %294 : vector<8x32xf32>
    %296 = vector.extract_strided_slice %289 {offsets = [0, 32], sizes = [8, 32], strides = [1, 1]} : vector<8x128xf32> to vector<8x32xf32>
    %297 = arith.negf %296 : vector<8x32xf32>
    %298 = math.exp %297 : vector<8x32xf32>
    %cst_98 = arith.constant 1.000000e+00 : f32
    %299 = vector.broadcast %cst_98 : f32 to vector<8x32xf32>
    %300 = arith.addf %299, %298 : vector<8x32xf32>
    %301 = arith.divf %299, %300 : vector<8x32xf32>
    %302 = vector.extract_strided_slice %289 {offsets = [0, 64], sizes = [8, 32], strides = [1, 1]} : vector<8x128xf32> to vector<8x32xf32>
    %303 = math.tanh %302 : vector<8x32xf32>
    %304 = vector.extract_strided_slice %289 {offsets = [0, 96], sizes = [8, 32], strides = [1, 1]} : vector<8x128xf32> to vector<8x32xf32>
    %305 = arith.negf %304 : vector<8x32xf32>
    %306 = math.exp %305 : vector<8x32xf32>
    %cst_99 = arith.constant 1.000000e+00 : f32
    %307 = vector.broadcast %cst_99 : f32 to vector<8x32xf32>
    %308 = arith.addf %307, %306 : vector<8x32xf32>
    %309 = arith.divf %307, %308 : vector<8x32xf32>
    %310 = arith.mulf %301, %273 : vector<8x32xf32>
    %311 = arith.mulf %295, %303 : vector<8x32xf32>
    %312 = arith.addf %310, %311 : vector<8x32xf32>
    %313 = math.tanh %312 : vector<8x32xf32>
    %314 = arith.mulf %309, %313 : vector<8x32xf32>
    %c0_100 = arith.constant 0 : index
    %315 = arith.index_cast %284 : i32 to index
    %c0_101 = arith.constant 0 : index
    %c0_102 = arith.constant 0 : index
    %316 = vector.load %arg4[%c0_100, %315, %c0_101, %c0_102] : memref<1x8x8x32xf32, #tpu.memory_space<vmem>>, vector<1x1x8x32xf32>
    %317 = vector.shape_cast %316 : vector<1x1x8x32xf32> to vector<8x32xf32>
    %318 = vector.shape_cast %314 : vector<8x32xf32> to vector<1x1x8x32xf32>
    tpu.vector_store %arg4[%c0_100, %315, %c0_101, %c0_102], %318 {strides = array<i32>} : memref<1x8x8x32xf32, #tpu.memory_space<vmem>>, vector<1x1x8x32xf32>,
    %c8_i32 = arith.constant 8 : i32
    %c0_103 = arith.constant 0 : index
    %c0_104 = arith.constant 0 : index
    %319 = vector.load %arg5[%c0_103, %c0_104] : memref<8x32xf32, #tpu.memory_space<vmem>>, vector<8x32xf32>
    tpu.vector_store %arg5[%c0_103, %c0_104], %314 {strides = array<i32>} : memref<8x32xf32, #tpu.memory_space<vmem>>, vector<8x32xf32>,
    %c0_105 = arith.constant 0 : index
    %c0_106 = arith.constant 0 : index
    %320 = vector.load %arg6[%c0_105, %c0_106] : memref<8x32xf32, #tpu.memory_space<vmem>>, vector<8x32xf32>
    tpu.vector_store %arg6[%c0_105, %c0_106], %312 {strides = array<i32>} : memref<8x32xf32, #tpu.memory_space<vmem>>, vector<8x32xf32>,
    return
  }
  func.func @transform_0(%arg0: i32, %arg1: i32) -> (i32, i32, i32, i32) {
    %c0_i32 = arith.constant 0 : i32
    %0 = arith.muli %arg0, %c0_i32 : i32
    %c2_i32 = arith.constant 2 : i32
    %1 = arith.muli %c2_i32, %arg0 : i32
    %c1_i32 = arith.constant 1 : i32
    %2 = arith.subi %c1_i32, %1 : i32
    %3 = arith.muli %2, %arg1 : i32
    %4 = arith.addi %0, %3 : i32
    %c0_i32_0 = arith.constant 0 : i32
    %c0_i32_1 = arith.constant 0 : i32
    %c0_i32_2 = arith.constant 0 : i32
    return %arg0, %4, %c0_i32_0, %c0_i32_1 : i32, i32, i32, i32
  }
  func.func @transform_1(%arg0: i32, %arg1: i32) -> (i32, i32, i32) {
    %c0_i32 = arith.constant 0 : i32
    %c0_i32_0 = arith.constant 0 : i32
    %c0_i32_1 = arith.constant 0 : i32
    return %arg0, %c0_i32, %c0_i32_0 : i32, i32, i32
  }
  func.func @transform_2(%arg0: i32, %arg1: i32) -> (i32, i32, i32, i32) {
    %c0_i32 = arith.constant 0 : i32
    %0 = arith.muli %arg0, %c0_i32 : i32
    %c2_i32 = arith.constant 2 : i32
    %1 = arith.muli %c2_i32, %arg0 : i32
    %c1_i32 = arith.constant 1 : i32
    %2 = arith.subi %c1_i32, %1 : i32
    %3 = arith.muli %2, %arg1 : i32
    %4 = arith.addi %0, %3 : i32
    %c0_i32_0 = arith.constant 0 : i32
    %c0_i32_1 = arith.constant 0 : i32
    %c0_i32_2 = arith.constant 0 : i32
    return %arg0, %4, %c0_i32_0, %c0_i32_1 : i32, i32, i32, i32
  }
}

module attributes {stable_mosaic.version = 11 : i64} {
  func.func @kernel(%arg0: i32, %arg1: memref<64x32xf32, #tpu.memory_space<vmem>>, %arg2: memref<64x32xf32, #tpu.memory_space<vmem>>, %arg3: memref<32x8xf32, #tpu.memory_space<vmem>>, %arg4: memref<32x8xf32, #tpu.memory_space<vmem>>, %arg5: memref<1x8xf32, #tpu.memory_space<vmem>>, %arg6: memref<64x8xf32, #tpu.memory_space<vmem>>) attributes {dimension_semantics = [#tpu.dimension_semantics<parallel>], iteration_bounds = array<i64: 1>, scalar_prefetch = 0 : i64, scratch_operands = 0 : i64, tpu.core_type = #tpu.core_type<tc>, window_params = [{transform_indices = @transform_0, window_bounds = array<i64: 64, 32>}, {transform_indices = @transform_1, window_bounds = array<i64: 64, 32>}, {pipeline_mode = #tpu.pipeline_mode<synchronous>, transform_indices = @transform_2, window_bounds = array<i64: 32, 8>}, {pipeline_mode = #tpu.pipeline_mode<synchronous>, transform_indices = @transform_3, window_bounds = array<i64: 32, 8>}, {pipeline_mode = #tpu.pipeline_mode<synchronous>, transform_indices = @transform_4, window_bounds = array<i64: 1, 8>}, {transform_indices = @transform_5, window_bounds = array<i64: 64, 8>}]} {
    %c0 = arith.constant 0 : index
    %c0_0 = arith.constant 0 : index
    %0 = vector.load %arg1[%c0, %c0_0] : memref<64x32xf32, #tpu.memory_space<vmem>>, vector<64x32xf32>
    %c0_1 = arith.constant 0 : index
    %c0_2 = arith.constant 0 : index
    %1 = vector.load %arg3[%c0_1, %c0_2] : memref<32x8xf32, #tpu.memory_space<vmem>>, vector<32x8xf32>
    %cst = arith.constant dense<0.000000e+00> : vector<64x8xf32>
    %2 = tpu.matmul %0, %1, %cst {dimension_numbers = #tpu.dot_dimension_numbers<[1], [0], [0], [1], [0, 0, 1, 1], [], []>} : vector<64x32xf32>, vector<32x8xf32>, vector<64x8xf32> -> vector<64x8xf32>
    %c0_3 = arith.constant 0 : index
    %c0_4 = arith.constant 0 : index
    %3 = vector.load %arg2[%c0_3, %c0_4] : memref<64x32xf32, #tpu.memory_space<vmem>>, vector<64x32xf32>
    %c0_5 = arith.constant 0 : index
    %c0_6 = arith.constant 0 : index
    %4 = vector.load %arg4[%c0_5, %c0_6] : memref<32x8xf32, #tpu.memory_space<vmem>>, vector<32x8xf32>
    %cst_7 = arith.constant dense<0.000000e+00> : vector<64x8xf32>
    %5 = tpu.matmul %3, %4, %cst_7 {dimension_numbers = #tpu.dot_dimension_numbers<[1], [0], [0], [1], [0, 0, 1, 1], [], []>} : vector<64x32xf32>, vector<32x8xf32>, vector<64x8xf32> -> vector<64x8xf32>
    %6 = arith.addf %2, %5 : vector<64x8xf32>
    %c0_8 = arith.constant 0 : index
    %c0_9 = arith.constant 0 : index
    %7 = vector.load %arg5[%c0_8, %c0_9] : memref<1x8xf32, #tpu.memory_space<vmem>>, vector<1x8xf32>
    %8 = vector.broadcast %7 : vector<1x8xf32> to vector<64x8xf32>
    %9 = arith.addf %6, %8 : vector<64x8xf32>
    %c0_10 = arith.constant 0 : index
    %c0_11 = arith.constant 0 : index
    %10 = vector.load %arg6[%c0_10, %c0_11] : memref<64x8xf32, #tpu.memory_space<vmem>>, vector<64x8xf32>
    tpu.vector_store %arg6[%c0_10, %c0_11], %9 {strides = array<i32>} : memref<64x8xf32, #tpu.memory_space<vmem>>, vector<64x8xf32>,
    return
  }
  func.func @transform_0(%arg0: i32) -> (i32, i32) {
    %c0_i32 = arith.constant 0 : i32
    %c0_i32_0 = arith.constant 0 : i32
    return %arg0, %c0_i32 : i32, i32
  }
  func.func @transform_1(%arg0: i32) -> (i32, i32) {
    %c0_i32 = arith.constant 0 : i32
    %c0_i32_0 = arith.constant 0 : i32
    return %arg0, %c0_i32 : i32, i32
  }
  func.func @transform_2(%arg0: i32) -> (i32, i32) {
    %c0_i32 = arith.constant 0 : i32
    %c0_i32_0 = arith.constant 0 : i32
    %c0_i32_1 = arith.constant 0 : i32
    return %c0_i32, %c0_i32_0 : i32, i32
  }
  func.func @transform_3(%arg0: i32) -> (i32, i32) {
    %c0_i32 = arith.constant 0 : i32
    %c0_i32_0 = arith.constant 0 : i32
    %c0_i32_1 = arith.constant 0 : i32
    return %c0_i32, %c0_i32_0 : i32, i32
  }
  func.func @transform_4(%arg0: i32) -> (i32, i32) {
    %c0_i32 = arith.constant 0 : i32
    %c0_i32_0 = arith.constant 0 : i32
    %c0_i32_1 = arith.constant 0 : i32
    return %c0_i32, %c0_i32_0 : i32, i32
  }
  func.func @transform_5(%arg0: i32) -> (i32, i32) {
    %c0_i32 = arith.constant 0 : i32
    %c0_i32_0 = arith.constant 0 : i32
    return %arg0, %c0_i32 : i32, i32
  }
}

</mosaic_0001>

<bundles_post_ra>
// kernel: blstm_entity_recognizer.5
= control target key start
LH: loop header
LB: loop body
LE: loop exit
PB: predicated region body
PF: predicated region fallthrough
CT: control target
= control target key end

     0   :  { %s627_s12 = smov 0   ;;  %s629_s13 = smov 0   ;;  %s700_s0 = inlined_call_operand.vmem [shape: f32[64,32], index: 0, kind: input, shape index: {}]   ;;  %s701_s1 = inlined_call_operand.vmem [shape: f32[2,32,128], index: 1, kind: input, shape index: {}]   ;;  %s702_s2 = inlined_call_operand.vmem [shape: f32[2,1,128], index: 2, kind: input, shape index: {}]   ;;  %s703_s3 = inlined_call_operand.vmem [shape: f32[2,64,128], index: 3, kind: output, shape index: {}]  }
   0x1   :  { %s631_s14 = smov 0  }
   0x2 LB: > { %s25_s15 = sadd.s32 1, %s601_s13  ;;  %p497_p0 = scmp.ge.s32.totalorder %s605_s14, 1  ;;  %s605_s14 = sphi %s631_s14, %s13_s14   ;;  %s601_s13 = sphi %s629_s13, %s705_s13   ;;  %s597_s12 = sphi %s627_s12, %s704_s12  }
   0x3   : > { %p27_p1 = scmp.ge.s32.totalorder %s25_s15, 2  ;;  %p170_p2 = scmp.lt.s32.totalorder %s605_s14, 3 }
   0x5   : > { %s707_s15 = smov (%p27_p1, %s25_s15), 0  ;;  %p171_p3 = pnand %p497_p0, %p170_p2 }
   0x6   : > { %p212_p4 = scmp.lt.s32.totalorder (!%p171_p3), %s597_s12, 1  ;;  %v230_v0 = vld [vmem:[%s700_s0] sm:$0xff] (!%p171_p3)  ;;  %vm249_vm0 = vcmask (!%p171_p3), 261120   ;;  %v231_v8 = vld [vmem:[%s700_s0 + $0x8] sm:$0xff] (!%p171_p3)  ;;  %v232_v10 = vld [vmem:[%s700_s0 + $0x10] sm:$0xff] (!%p171_p3) }
   0x7   : > { %174 = sbr.rel (%p171_p3) target bundleno = 248 (0xf8), region = 32  ;;  %v234_v1 = vld [vmem:[%s700_s0 + $0x20] sm:$0xff] (!%p171_p3)  ;;  %535 = vmatprep.mubr.msk.f32.mxu0 (!%p171_p3), %vm249_vm0, %v230_v0  ;;  %v235_v9 = vld [vmem:[%s700_s0 + $0x28] sm:$0xff] (!%p171_p3)  ;;  %v236_v11 = vld [vmem:[%s700_s0 + $0x30] sm:$0xff] (!%p171_p3) }
   0x8   : > { %541 = vmatprep.mubr.msk.f32.mxu1 (!%p171_p3), %vm249_vm0, %v234_v1  ;;  %v233_v12 = vld [vmem:[%s700_s0 + $0x18] sm:$0xff] (!%p171_p3) }
   0x9   : > { %v237_v13 = vld [vmem:[%s700_s0 + $0x38] sm:$0xff] (!%p171_p3) }
   0xe   : > { %s709_s12 = smov (!%p212_p4, %s597_s12), 1 }
   0xf   : > { %s513_s20 = sshll.u32 %s709_s12, 5  ;;  %s219_s11 = scalar_lea.vmem %s702_s2, %s709_s12 }
  0x10   : > { %s216_s23 = scalar_lea.vmem %s701_s1, %s513_s20  ;;  %s514_s16 = sshll.u32 %s709_s12, 6  ;;  %v502_v14 = vld [vmem:[%s219_s11] ss:$0 sm:$0xff] }
  0x11   : > { %v238_v2 = vld [vmem:[%s216_s23] sm:$0xff]  ;;  %v239_v3 = vld [vmem:[%s216_s23 + $0x8] sm:$0xff]  ;;  %v240_v4 = vld [vmem:[%s216_s23 + $0x10] sm:$0xff]  ;;  %s228_s19 = scalar_lea.vmem %s703_s3, %s514_s16 }
  0x12   : > { %v547_v5 = vpack.c.bf16 %v239_v3, %v238_v2  ;;  %v241_v6 = vld [vmem:[%s216_s23 + $0x18] sm:$0xff] }
  0x13   : > { %v551_v7 = vpack.c.bf16 %v241_v6, %v240_v4 }
  0x14   : > { %548 = vmatprep.subr.bf16.mxu0 %v547_v5  ;;  %555 = vmatprep.subr.bf16.mxu1 %v547_v5 }
  0x15   : > { %550 = vmatpush3.bf16.msra.mxu0 %v547_v5  ;;  %557 = vmatpush3.bf16.msra.mxu1 %v547_v5 }
  0x16   : > { %552 = vmatprep.subr.bf16.mxu0 %v551_v7  ;;  %556 = vmatprep.subr.bf16.mxu1 %v551_v7 }
  0x19   : > { %554 = vmatpush3.bf16.msra.mxu0 %v551_v7  ;;  %558 = vmatpush3.bf16.msra.mxu1 %v551_v7 }
  0x1c   : > { %536 = vmatmul.mubr.msk.f32.vlgmr.msra.gmra.mrb[0].mxu0 %vm249_vm0, %v231_v8  ;;  %542 = vmatmul.mubr.msk.f32.vlgmr.msra.gmra.mrb[0].mxu1 %vm249_vm0, %v235_v9 }
  0x1d   : > { %538 = vmatprep.mubr.msk.f32.mxu0 %vm249_vm0, %v232_v10  ;;  %544 = vmatprep.mubr.msk.f32.mxu1 %vm249_vm0, %v236_v11 }
  0x20   : > { %539 = vmatmul.mubr.msk.f32.gmra.mrb[2].mxu0 %vm249_vm0, %v233_v12  ;;  %545 = vmatmul.mubr.msk.f32.gmra.mrb[2].mxu1 %vm249_vm0, %v237_v13 }
  0xef   : > { %v537_v15 = vpop.f32.mrb[0].mxu0  ;;  %v543_v16 = vpop.f32.mrb[0].mxu1 }
  0xf0   : > { %v346_v17 = vadd.f32 %v537_v15, %v502_v14  ;;  %v366_v18 = vadd.f32 %v543_v16, %v502_v14  ;;  %v340_v19 = vpop.f32.mrb[1].mxu0  ;;  %v360_v20 = vpop.f32.mrb[1].mxu1 }
  0xf1   : > { %v341_v21 = vadd.f32 %v502_v14, %v340_v19  ;;  %v361_v22 = vadd.f32 %v502_v14, %v360_v20 }
  0xf2   : > { %380 = vst [vmem:[%s228_s19 + $0x8] sm:$0xff] %v346_v17  ;;  %384 = vst [vmem:[%s228_s19 + $0x28] sm:$0xff] %v366_v18 }
  0xf3   : > { %379 = vst [vmem:[%s228_s19] sm:$0xff] %v341_v21  ;;  %383 = vst [vmem:[%s228_s19 + $0x20] sm:$0xff] %v361_v22  ;;  %v540_v23 = vpop.f32.mrb[2].mxu0  ;;  %v546_v24 = vpop.f32.mrb[2].mxu1 }
  0xf4   : > { %v356_v25 = vadd.f32 %v540_v23, %v502_v14  ;;  %v376_v26 = vadd.f32 %v546_v24, %v502_v14  ;;  %v350_v27 = vpop.f32.mrb[3].mxu0  ;;  %v370_v28 = vpop.f32.mrb[3].mxu1 }
  0xf5   : > { %v351_v29 = vadd.f32 %v502_v14, %v350_v27  ;;  %v371_v30 = vadd.f32 %v502_v14, %v370_v28 }
  0xf6   : > { %382 = vst [vmem:[%s228_s19 + $0x18] sm:$0xff] %v356_v25  ;;  %386 = vst [vmem:[%s228_s19 + $0x38] sm:$0xff] %v376_v26 }
  0xf7   : > { %381 = vst [vmem:[%s228_s19 + $0x10] sm:$0xff] %v351_v29  ;;  %385 = vst [vmem:[%s228_s19 + $0x30] sm:$0xff] %v371_v30 }
  0xf8 PF: > { %s13_s14 = sadd.s32 1, %s605_s14   ;;  %s704_s12 = smov %s601_s13 }
  0xf9   : > { %p10_p5 = scmp.ge.s32.totalorder %s13_s14, 4   ;;  %s705_s13 = smov %s707_s15 }
  0xfb   :  { %12 = sbr.rel (!%p10_p5) target bundleno = 2 (0x2), region = 68 }

// kernel: blstm_entity_recognizer.9
= control target key start
LH: loop header
LB: loop body
LE: loop exit
PB: predicated region body
PF: predicated region fallthrough
CT: control target
= control target key end

     0   :  { %vm44_vm0 = vcmask 261120   ;;  %vm318_vm1 = vcmask 64512   ;;  %s589_s3 = inlined_call_operand.vmem [shape: f32[32,8], index: 3, kind: input, shape index: {}]   ;;  %s590_s2 = inlined_call_operand.vmem [shape: f32[32,8], index: 2, kind: input, shape index: {}]   ;;  %s591_s1 = inlined_call_operand.vmem [shape: f32[64,32], index: 1, kind: input, shape index: {}]   ;;  %s592_s0 = inlined_call_operand.vmem [shape: f32[64,32], index: 0, kind: input, shape index: {}]   ;;  %s593_s4 = inlined_call_operand.vmem [shape: f32[1,8], index: 4, kind: input, shape index: {}]   ;;  %s594_s5 = inlined_call_operand.vmem [shape: f32[64,8], index: 5, kind: output, shape index: {}]  }
   0x1   :  { %v40_v0 = vld [vmem:[%s589_s3] sm:$0xff]  ;;  %v41_v1 = vld [vmem:[%s589_s3 + $0x8] sm:$0xff]  ;;  %v42_v5 = vld [vmem:[%s589_s3 + $0x10] sm:$0xff] }
   0x2   :  { %v28_v2 = vld [vmem:[%s590_s2] sm:$0xff]  ;;  %v412_v3 = vpack.c.bf16 %v41_v1, %v40_v0  ;;  %v29_v4 = vld [vmem:[%s590_s2 + $0x8] sm:$0xff]  ;;  %v43_v6 = vld [vmem:[%s589_s3 + $0x18] sm:$0xff] }
   0x3   :  { %v420_v7 = vpack.c.bf16 %v29_v4, %v28_v2  ;;  %v416_v8 = vpack.c.bf16 %v43_v6, %v42_v5  ;;  %v30_v9 = vld [vmem:[%s590_s2 + $0x10] sm:$0xff]  ;;  %v31_v10 = vld [vmem:[%s590_s2 + $0x18] sm:$0xff]  ;;  %v32_v11 = vld [vmem:[%s591_s1] sm:$0xff] }
   0x4   :  { %413 = vmatprep.subr.bf16.mxu1 %v412_v3  ;;  %v424_v12 = vpack.c.bf16 %v31_v10, %v30_v9  ;;  %380 = vmatprep.mubr.msk.f32.mxu1 %vm44_vm0, %v32_v11  ;;  %v20_v13 = vld [vmem:[%s592_s0] sm:$0xff]  ;;  %v33_v14 = vld [vmem:[%s591_s1 + $0x8] sm:$0xff]  ;;  %v34_v16 = vld [vmem:[%s591_s1 + $0x10] sm:$0xff] }
   0x5   :  { %421 = vmatprep.subr.bf16.mxu0 %v420_v7  ;;  %415 = vmatpush3.bf16.msra.mxu1 %v412_v3  ;;  %v21_v15 = vld [vmem:[%s592_s0 + $0x8] sm:$0xff]  ;;  %v22_v17 = vld [vmem:[%s592_s0 + $0x10] sm:$0xff]  ;;  %v35_v18 = vld [vmem:[%s591_s1 + $0x18] sm:$0xff] }
   0x6   :  { %423 = vmatpush3.bf16.msra.mxu0 %v420_v7  ;;  %417 = vmatprep.subr.bf16.mxu1 %v416_v8  ;;  %v23_v19 = vld [vmem:[%s592_s0 + $0x18] sm:$0xff]  ;;  %v36_v20 = vld [vmem:[%s591_s1 + $0x20] sm:$0xff]  ;;  %v37_v22 = vld [vmem:[%s591_s1 + $0x28] sm:$0xff] }
   0x7   :  { %425 = vmatprep.subr.bf16.mxu0 %v424_v12  ;;  %400 = vmatprep.mubr.msk.f32.mxu0 %vm44_vm0, %v20_v13  ;;  %v24_v21 = vld [vmem:[%s592_s0 + $0x20] sm:$0xff]  ;;  %v25_v23 = vld [vmem:[%s592_s0 + $0x28] sm:$0xff]  ;;  %v38_v24 = vld [vmem:[%s591_s1 + $0x30] sm:$0xff] }
   0x8   :  { %v26_v25 = vld [vmem:[%s592_s0 + $0x30] sm:$0xff]  ;;  %v39_v26 = vld [vmem:[%s591_s1 + $0x38] sm:$0xff]  ;;  %v347_v30 = vld [vmem:[%s593_s4] ss:$0 sm:$0xff] }
   0x9   :  { %419 = vmatpush3.bf16.msra.mxu1 %v416_v8  ;;  %v27_v27 = vld [vmem:[%s592_s0 + $0x38] sm:$0xff] }
   0xa   :  { %427 = vmatpush3.bf16.msra.mxu0 %v424_v12 }
   0xc   :  { %381 = vmatmul.mubr.msk.f32.vlgmr.msra.gmra.mrb[0].mxu1 %vm44_vm0, %v33_v14 }
   0xd   :  { %401 = vmatmul.mubr.msk.f32.vlgmr.msra.gmra.mrb[0].mxu0 %vm44_vm0, %v21_v15  ;;  %383 = vmatprep.mubr.msk.f32.mxu1 %vm44_vm0, %v34_v16 }
   0xe   :  { %403 = vmatprep.mubr.msk.f32.mxu0 %vm44_vm0, %v22_v17 }
  0x10   :  { %384 = vmatmul.mubr.msk.f32.gmra.mrb[2].mxu1 %vm44_vm0, %v35_v18 }
  0x11   :  { %404 = vmatmul.mubr.msk.f32.gmra.mrb[2].mxu0 %vm44_vm0, %v23_v19  ;;  %386 = vmatprep.mubr.msk.f32.mxu1 %vm44_vm0, %v36_v20 }
  0x12   :  { %406 = vmatprep.mubr.msk.f32.mxu0 %vm44_vm0, %v24_v21 }
  0x14   :  { %387 = vmatmul.mubr.msk.f32.gmra.mrb[4].mxu1 %vm44_vm0, %v37_v22 }
  0x15   :  { %407 = vmatmul.mubr.msk.f32.gmra.mrb[4].mxu0 %vm44_vm0, %v25_v23  ;;  %389 = vmatprep.mubr.msk.f32.mxu1 %vm44_vm0, %v38_v24 }
  0x16   :  { %409 = vmatprep.mubr.msk.f32.mxu0 %vm44_vm0, %v26_v25 }
  0x18   :  { %390 = vmatmul.mubr.msk.f32.gmra.mrb[6].mxu1 %vm44_vm0, %v39_v26 }
  0x19   :  { %410 = vmatmul.mubr.msk.f32.gmra.mrb[6].mxu0 %vm44_vm0, %v27_v27 }
  0xdf   :  { %v382_v28 = vpop.f32.mrb[0].mxu1 }
  0xe0   :  { %v402_v29 = vpop.f32.mrb[0].mxu0  ;;  %v135_v31 = vpop.f32.mrb[1].mxu1 }
  0xe1   :  { %v270_v32 = vadd.f32 %v402_v29, %v382_v28  ;;  %v264_v33 = vpop.f32.mrb[1].mxu0 }
  0xe2   :  { %v265_v34 = vadd.f32 %v264_v33, %v135_v31 }
  0xe3   :  { %v311_v35 = vadd.f32 %v347_v30, %v270_v32  ;;  %v385_v36 = vpop.f32.mrb[2].mxu1 }
  0xe4   :  { %v310_v37 = vadd.f32 %v347_v30, %v265_v34  ;;  %v405_v38 = vpop.f32.mrb[2].mxu0  ;;  %v145_v39 = vpop.f32.mrb[3].mxu1 }
  0xe5   :  { %320 = vst.msk [vmem:[%s594_s5 + $0x8] sm:$0xff] %vm318_vm1, %v311_v35  ;;  %v280_v40 = vadd.f32 %v405_v38, %v385_v36  ;;  %v274_v41 = vpop.f32.mrb[3].mxu0 }
  0xe6   :  { %319 = vst.msk [vmem:[%s594_s5] sm:$0xff] %vm318_vm1, %v310_v37  ;;  %v275_v42 = vadd.f32 %v274_v41, %v145_v39 }
  0xe7   :  { %v313_v43 = vadd.f32 %v347_v30, %v280_v40  ;;  %v388_v44 = vpop.f32.mrb[4].mxu1 }
  0xe8   :  { %v312_v45 = vadd.f32 %v347_v30, %v275_v42  ;;  %v408_v46 = vpop.f32.mrb[4].mxu0  ;;  %v155_v47 = vpop.f32.mrb[5].mxu1 }
  0xe9   :  { %322 = vst.msk [vmem:[%s594_s5 + $0x18] sm:$0xff] %vm318_vm1, %v313_v43  ;;  %v290_v48 = vadd.f32 %v408_v46, %v388_v44  ;;  %v284_v49 = vpop.f32.mrb[5].mxu0 }
  0xea   :  { %321 = vst.msk [vmem:[%s594_s5 + $0x10] sm:$0xff] %vm318_vm1, %v312_v45  ;;  %v285_v50 = vadd.f32 %v284_v49, %v155_v47 }
  0xeb   :  { %v315_v51 = vadd.f32 %v347_v30, %v290_v48  ;;  %v391_v52 = vpop.f32.mrb[6].mxu1 }
  0xec   :  { %v314_v53 = vadd.f32 %v347_v30, %v285_v50  ;;  %v411_v54 = vpop.f32.mrb[6].mxu0  ;;  %v165_v55 = vpop.f32.mrb[7].mxu1 }
  0xed   :  { %324 = vst.msk [vmem:[%s594_s5 + $0x28] sm:$0xff] %vm318_vm1, %v315_v51  ;;  %v300_v56 = vadd.f32 %v411_v54, %v391_v52  ;;  %v294_v57 = vpop.f32.mrb[7].mxu0 }
  0xee   :  { %323 = vst.msk [vmem:[%s594_s5 + $0x20] sm:$0xff] %vm318_vm1, %v314_v53  ;;  %v295_v58 = vadd.f32 %v294_v57, %v165_v55 }
  0xef   :  { %v317_v59 = vadd.f32 %v347_v30, %v300_v56 }
  0xf0   :  { %v316_v60 = vadd.f32 %v347_v30, %v295_v58 }
  0xf1   :  { %326 = vst.msk [vmem:[%s594_s5 + $0x38] sm:$0xff] %vm318_vm1, %v317_v59 }
  0xf2   :  { %325 = vst.msk [vmem:[%s594_s5 + $0x30] sm:$0xff] %vm318_vm1, %v316_v60 }

// kernel: blstm_entity_recognizer.7
= control target key start
LH: loop header
LB: loop body
LE: loop exit
PB: predicated region body
PF: predicated region fallthrough
CT: control target
= control target key end

     0   :  { %s965_s18 = smov 0   ;;  %s967_s19 = smov 0   ;;  %s1083_s0 = inlined_call_operand.vmem [shape: f32[64,32], index: 0, kind: input, shape index: {}]   ;;  %s1084_s1 = inlined_call_operand.vmem [shape: f32[64,32], index: 1, kind: input, shape index: {}]   ;;  %s1085_s2 = inlined_call_operand.vmem [shape: f32[2,32,128], index: 2, kind: input, shape index: {}]   ;;  %s1086_s3 = inlined_call_operand.vmem [shape: f32[2,32,128], index: 3, kind: input, shape index: {}]   ;;  %s1087_s4 = inlined_call_operand.vmem [shape: f32[2,1,128], index: 4, kind: input, shape index: {}]   ;;  %s1088_s5 = inlined_call_operand.vmem [shape: f32[2,64,128], index: 5, kind: output, shape index: {}]  }
   0x1   :  { %s969_s20 = smov 0  }
   0x2 LB: > { %s27_s21 = sadd.s32 1, %s929_s19  ;;  %p770_p0 = scmp.ge.s32.totalorder %s933_s20, 1  ;;  %s933_s20 = sphi %s969_s20, %s15_s20   ;;  %s929_s19 = sphi %s967_s19, %s1090_s19   ;;  %s925_s18 = sphi %s965_s18, %s1089_s18  }
   0x3   : > { %p29_p1 = scmp.ge.s32.totalorder %s27_s21, 2  ;;  %p241_p2 = scmp.lt.s32.totalorder %s933_s20, 3 }
   0x5   : > { %s1092_s21 = smov (%p29_p1, %s27_s21), 0  ;;  %p242_p3 = pnand %p770_p0, %p241_p2 }
   0x6   : > { %p303_p4 = scmp.lt.s32.totalorder (!%p242_p3), %s925_s18, 1  ;;  %v338_v0 = vld [vmem:[%s1084_s1] sm:$0xff] (!%p242_p3)  ;;  %vm350_vm0 = vcmask (!%p242_p3), 261120   ;;  %v339_v14 = vld [vmem:[%s1084_s1 + $0x8] sm:$0xff] (!%p242_p3)  ;;  %v340_v16 = vld [vmem:[%s1084_s1 + $0x10] sm:$0xff] (!%p242_p3) }
   0x7   : > { %245 = sbr.rel (%p242_p3) target bundleno = 259 (0x103), region = 40  ;;  %v326_v1 = vld [vmem:[%s1083_s0] sm:$0xff] (!%p242_p3)  ;;  %831 = vmatprep.mubr.msk.f32.mxu1 (!%p242_p3), %vm350_vm0, %v338_v0  ;;  %v327_v15 = vld [vmem:[%s1083_s0 + $0x8] sm:$0xff] (!%p242_p3)  ;;  %v328_v17 = vld [vmem:[%s1083_s0 + $0x10] sm:$0xff] (!%p242_p3) }
   0x8   : > { %851 = vmatprep.mubr.msk.f32.mxu0 (!%p242_p3), %vm350_vm0, %v326_v1  ;;  %v341_v18 = vld [vmem:[%s1084_s1 + $0x18] sm:$0xff] (!%p242_p3)  ;;  %v342_v20 = vld [vmem:[%s1084_s1 + $0x20] sm:$0xff] (!%p242_p3)  ;;  %v343_v22 = vld [vmem:[%s1084_s1 + $0x28] sm:$0xff] (!%p242_p3) }
   0x9   : > { %v329_v19 = vld [vmem:[%s1083_s0 + $0x18] sm:$0xff] (!%p242_p3)  ;;  %v330_v21 = vld [vmem:[%s1083_s0 + $0x20] sm:$0xff] (!%p242_p3)  ;;  %v331_v23 = vld [vmem:[%s1083_s0 + $0x28] sm:$0xff] (!%p242_p3) }
   0xa   : > { %v344_v24 = vld [vmem:[%s1084_s1 + $0x30] sm:$0xff] (!%p242_p3)  ;;  %v345_v26 = vld [vmem:[%s1084_s1 + $0x38] sm:$0xff] (!%p242_p3) }
   0xb   : > { %v332_v25 = vld [vmem:[%s1083_s0 + $0x30] sm:$0xff] (!%p242_p3)  ;;  %v333_v27 = vld [vmem:[%s1083_s0 + $0x38] sm:$0xff] (!%p242_p3) }
   0xe   : > { %s1094_s18 = smov (!%p303_p4, %s925_s18), 1 }
   0xf   : > { %s796_s26 = sshll.u32 %s1094_s18, 5  ;;  %s315_s17 = scalar_lea.vmem %s1087_s4, %s1094_s18 }
  0x10   : > { %s312_s29 = scalar_lea.vmem %s1086_s3, %s796_s26  ;;  %s307_s7 = scalar_lea.vmem %s1085_s2, %s796_s26  ;;  %v793_v29 = vld [vmem:[%s315_s17] ss:$0 sm:$0xff] }
  0x11   : > { %v346_v2 = vld [vmem:[%s312_s29] sm:$0xff]  ;;  %v347_v3 = vld [vmem:[%s312_s29 + $0x8] sm:$0xff]  ;;  %v348_v4 = vld [vmem:[%s312_s29 + $0x10] sm:$0xff]  ;;  %s798_s22 = sshll.u32 %s1094_s18, 6 }
  0x12   : > { %v863_v5 = vpack.c.bf16 %v347_v3, %v346_v2  ;;  %v334_v6 = vld [vmem:[%s307_s7] sm:$0xff]  ;;  %v335_v7 = vld [vmem:[%s307_s7 + $0x8] sm:$0xff]  ;;  %v349_v8 = vld [vmem:[%s312_s29 + $0x18] sm:$0xff]  ;;  %s1064_s25 = scalar_lea.vmem %s1088_s5, %s798_s22 }
  0x13   : > { %v871_v9 = vpack.c.bf16 %v335_v7, %v334_v6  ;;  %v867_v10 = vpack.c.bf16 %v349_v8, %v348_v4  ;;  %v336_v11 = vld [vmem:[%s307_s7 + $0x10] sm:$0xff]  ;;  %v337_v12 = vld [vmem:[%s307_s7 + $0x18] sm:$0xff] }
  0x14   : > { %864 = vmatprep.subr.bf16.mxu1 %v863_v5  ;;  %v875_v13 = vpack.c.bf16 %v337_v12, %v336_v11 }
  0x15   : > { %872 = vmatprep.subr.bf16.mxu0 %v871_v9  ;;  %866 = vmatpush3.bf16.msra.mxu1 %v863_v5 }
  0x16   : > { %874 = vmatpush3.bf16.msra.mxu0 %v871_v9  ;;  %868 = vmatprep.subr.bf16.mxu1 %v867_v10 }
  0x17   : > { %876 = vmatprep.subr.bf16.mxu0 %v875_v13 }
  0x19   : > { %870 = vmatpush3.bf16.msra.mxu1 %v867_v10 }
  0x1a   : > { %878 = vmatpush3.bf16.msra.mxu0 %v875_v13 }
  0x1c   : > { %832 = vmatmul.mubr.msk.f32.vlgmr.msra.gmra.mrb[0].mxu1 %vm350_vm0, %v339_v14 }
  0x1d   : > { %852 = vmatmul.mubr.msk.f32.vlgmr.msra.gmra.mrb[0].mxu0 %vm350_vm0, %v327_v15  ;;  %834 = vmatprep.mubr.msk.f32.mxu1 %vm350_vm0, %v340_v16 }
  0x1e   : > { %854 = vmatprep.mubr.msk.f32.mxu0 %vm350_vm0, %v328_v17 }
  0x20   : > { %835 = vmatmul.mubr.msk.f32.gmra.mrb[2].mxu1 %vm350_vm0, %v341_v18 }
  0x21   : > { %855 = vmatmul.mubr.msk.f32.gmra.mrb[2].mxu0 %vm350_vm0, %v329_v19  ;;  %837 = vmatprep.mubr.msk.f32.mxu1 %vm350_vm0, %v342_v20 }
  0x22   : > { %857 = vmatprep.mubr.msk.f32.mxu0 %vm350_vm0, %v330_v21 }
  0x24   : > { %838 = vmatmul.mubr.msk.f32.gmra.mrb[4].mxu1 %vm350_vm0, %v343_v22 }
  0x25   : > { %858 = vmatmul.mubr.msk.f32.gmra.mrb[4].mxu0 %vm350_vm0, %v331_v23  ;;  %840 = vmatprep.mubr.msk.f32.mxu1 %vm350_vm0, %v344_v24 }
  0x26   : > { %860 = vmatprep.mubr.msk.f32.mxu0 %vm350_vm0, %v332_v25 }
  0x28   : > { %841 = vmatmul.mubr.msk.f32.gmra.mrb[6].mxu1 %vm350_vm0, %v345_v26 }
  0x29   : > { %861 = vmatmul.mubr.msk.f32.gmra.mrb[6].mxu0 %vm350_vm0, %v333_v27 }
  0xef   : > { %v833_v28 = vpop.f32.mrb[0].mxu1 }
  0xf0   : > { %v853_v30 = vpop.f32.mrb[0].mxu0  ;;  %v441_v31 = vpop.f32.mrb[1].mxu1 }
  0xf1   : > { %v576_v32 = vadd.f32 %v853_v30, %v833_v28  ;;  %v570_v33 = vpop.f32.mrb[1].mxu0 }
  0xf2   : > { %v571_v34 = vadd.f32 %v570_v33, %v441_v31 }
  0xf3   : > { %v617_v35 = vadd.f32 %v793_v29, %v576_v32  ;;  %v836_v36 = vpop.f32.mrb[2].mxu1 }
  0xf4   : > { %v616_v37 = vadd.f32 %v793_v29, %v571_v34  ;;  %v856_v38 = vpop.f32.mrb[2].mxu0  ;;  %v451_v39 = vpop.f32.mrb[3].mxu1 }
  0xf5   : > { %625 = vst [vmem:[%s1064_s25 + $0x8] sm:$0xff] %v617_v35  ;;  %v586_v40 = vadd.f32 %v856_v38, %v836_v36  ;;  %v580_v41 = vpop.f32.mrb[3].mxu0 }
  0xf6   : > { %624 = vst [vmem:[%s1064_s25] sm:$0xff] %v616_v37  ;;  %v581_v42 = vadd.f32 %v580_v41, %v451_v39 }
  0xf7   : > { %v619_v43 = vadd.f32 %v793_v29, %v586_v40  ;;  %v839_v44 = vpop.f32.mrb[4].mxu1 }
  0xf8   : > { %v618_v45 = vadd.f32 %v793_v29, %v581_v42  ;;  %v859_v46 = vpop.f32.mrb[4].mxu0  ;;  %v461_v47 = vpop.f32.mrb[5].mxu1 }
  0xf9   : > { %627 = vst [vmem:[%s1064_s25 + $0x18] sm:$0xff] %v619_v43  ;;  %v596_v48 = vadd.f32 %v859_v46, %v839_v44  ;;  %v590_v49 = vpop.f32.mrb[5].mxu0 }
  0xfa   : > { %626 = vst [vmem:[%s1064_s25 + $0x10] sm:$0xff] %v618_v45  ;;  %v591_v50 = vadd.f32 %v590_v49, %v461_v47 }
  0xfb   : > { %v621_v51 = vadd.f32 %v793_v29, %v596_v48  ;;  %v842_v52 = vpop.f32.mrb[6].mxu1 }
  0xfc   : > { %v620_v53 = vadd.f32 %v793_v29, %v591_v50  ;;  %v862_v54 = vpop.f32.mrb[6].mxu0  ;;  %v471_v55 = vpop.f32.mrb[7].mxu1 }
  0xfd   : > { %629 = vst [vmem:[%s1064_s25 + $0x28] sm:$0xff] %v621_v51  ;;  %v606_v56 = vadd.f32 %v862_v54, %v842_v52  ;;  %v600_v57 = vpop.f32.mrb[7].mxu0 }
  0xfe   : > { %628 = vst [vmem:[%s1064_s25 + $0x20] sm:$0xff] %v620_v53  ;;  %v601_v58 = vadd.f32 %v600_v57, %v471_v55 }
  0xff   : > { %v623_v59 = vadd.f32 %v793_v29, %v606_v56 }
 0x100   : > { %v622_v60 = vadd.f32 %v793_v29, %v601_v58 }
 0x101   : > { %631 = vst [vmem:[%s1064_s25 + $0x38] sm:$0xff] %v623_v59 }
 0x102   : > { %630 = vst [vmem:[%s1064_s25 + $0x30] sm:$0xff] %v622_v60 }
 0x103 PF: > { %s15_s20 = sadd.s32 1, %s933_s20   ;;  %s1089_s18 = smov %s929_s19 }
 0x104   : > { %p12_p5 = scmp.ge.s32.totalorder %s15_s20, 4   ;;  %s1090_s19 = smov %s1092_s21 }
 0x106   :  { %14 = sbr.rel (!%p12_p5) target bundleno = 2 (0x2), region = 82 }

// kernel: blstm_entity_recognizer.6
= control target key start
LH: loop header
LB: loop body
LE: loop exit
PB: predicated region body
PF: predicated region fallthrough
CT: control target
= control target key end

     0   :  { %s1668_s9 = smov 0   ;;  %s1670_s10 = smov 0   ;;  %s1886_s0 = inlined_call_operand.vmem [shape: f32[2,8,8,128], index: 0, kind: input, shape index: {}]   ;;  %s1887_s1 = inlined_call_operand.vmem [shape: f32[2,32,128], index: 1, kind: input, shape index: {}]   ;;  %s1888_s2 = inlined_call_operand.vmem [shape: f32[2,8,8,32], index: 2, kind: output, shape index: {}]  }
   0x1   :  { %s1672_s11 = smov 0  }
   0x2 LB: > { %s24_s12 = sadd.s32 1, %s1641_s10  ;;  %p1311_p0 = scmp.ge.s32.totalorder %s1645_s11, 1  ;;  %s1645_s11 = sphi %s1672_s11, %s12_s11   ;;  %s1641_s10 = sphi %s1670_s10, %s1890_s10   ;;  %s1637_s9 = sphi %s1668_s9, %s1889_s9  }
   0x3   : > { %p26_p1 = scmp.ge.s32.totalorder %s24_s12, 2  ;;  %p161_p2 = scmp.lt.s32.totalorder %s1645_s11, 3 }
   0x5   : > { %s1892_s12 = smov (%p26_p1, %s24_s12), 0  ;;  %p162_p3 = pnand %p1311_p0, %p161_p2 }
   0x6   : > { %p206_p4 = scmp.lt.s32.totalorder (!%p162_p3), %s1637_s9, 1  ;;  %vm243_vm0 = vcmask (!%p162_p3), 261120   ;;  %v1647_v0 = vmov (!%p162_p3), 0.0|0.0   ;;  %vm1648_vm1 = vmmov (!%p162_p3), 0   ;;  %v1649_v1 = vmov (!%p162_p3), 0.0   ;;  %s1320_s19 = smul.u32 (!%p162_p3), 56, %s1637_s9 }
   0x7   : > { %165 = sbr.rel (%p162_p3) target bundleno = 5645 (0x160d), region = 28  ;;  %1481 = vmatprep.subr.bf16.mxu0 (!%p162_p3), %v1647_v0  ;;  %1401 = vmatprep.mubr.msk.f32.mxu0 (!%p162_p3), %vm1648_vm1, %v1649_v1  ;;  %244 = vst.msk [vmem:[#allocation2] sm:$0xff] (!%p162_p3), %vm243_vm0, %v1649_v1  ;;  %245 = vst.msk [vmem:[#allocation3] sm:$0xff] (!%p162_p3), %vm243_vm0, %v1649_v1  ;;  %s1650_s24 = smov (!%p162_p3), 64  }
   0x8   : > { %1487 = vmatprep.subr.bf16.mxu1 (!%p162_p3), %v1647_v0  ;;  %1412 = vmatprep.mubr.msk.f32.mxu1 (!%p162_p3), %vm1648_vm1, %v1649_v1  ;;  %s1651_s25 = smov (!%p162_p3), 32   ;;  %s366_s30 = smul.u32 (!%p162_p3), 6, %s1637_s9 }
   0x9   : > { %s1762_s3 = ssub.s32 (!%p162_p3), 1, %s1637_s9  ;;  %s475_s8 = smul.u32 (!%p162_p3), 5, %s1637_s9 }
   0xa   : > { %s1765_s4 = sadd.s32 (!%p162_p3), %s366_s30, %s1762_s3  ;;  %s693_s27 = smul.u32 (!%p162_p3), 3, %s1637_s9 }
   0xb   : > { %s1323_s5 = sshll.u32 (!%p162_p3), %s1765_s4, 3 }
   0xe   : > { %s1697_s13 = scalar_select %p206_p4, %s1637_s9, 1  ;;  %v250_v8 = vld [vmem:[#allocation2] sm:$0xff]  ;;  %v251_v14 = vld [vmem:[#allocation3] sm:$0xff] }
  0x10   : > { %s1351_s14 = sshll.u32 %s1697_s13, 5  ;;  %s1350_s18 = sshll.u32 %s1697_s13, 6 }
  0x11   : > { %s222_s17 = scalar_lea.vmem %s1887_s1, %s1351_s14  ;;  %s1732_s22 = scalar_lea.vmem %s1886_s0, %s1350_s18 }
  0x12   : > { %v246_v2 = vld [vmem:[%s222_s17] sm:$0xff]  ;;  %v247_v3 = vld [vmem:[%s222_s17 + $0x8] sm:$0xff]  ;;  %v248_v4 = vld [vmem:[%s222_s17 + $0x10] sm:$0xff]  ;;  %s254_s23 = scalar_lea.vmem %s1732_s22, %s1320_s19  ;;  %s1747_s28 = scalar_lea.vmem %s1888_s2, %s1350_s18 }
  0x13   : > { %v1706_v5 = vpack.c.bf16 %v247_v3, %v246_v2  ;;  %v249_v6 = vld [vmem:[%s222_s17 + $0x18] sm:$0xff]  ;;  %v255_v9 = vld [vmem:[%s254_s23] sm:$0xff]  ;;  %s363_s29 = scalar_lea.vmem %s1747_s28, %s1320_s19  ;;  %s369_s6 = scalar_lea.vmem %s1732_s22, %s1323_s5 }
  0x14   : > { %v1709_v7 = vpack.c.bf16 %v249_v6, %v248_v4  ;;  %v370_v29 = vld [vmem:[%s369_s6] sm:$0xff]  ;;  %s472_s7 = scalar_lea.vmem %s1747_s28, %s1323_s5  ;;  %s1326_s13 = sshll.u32 %s1762_s3, 1 }
  0x15   : > { %1483 = vmatpush3.bf16.msra.mxu0 %v1706_v5  ;;  %1489 = vmatpush3.bf16.msra.mxu1 %v1706_v5  ;;  %s1784_s14 = sadd.s32 %s1326_s13, %s475_s8  ;;  %s583_s18 = smul.u32 3, %s1762_s3 }
  0x16   : > { %1484 = vmatprep.subr.bf16.mxu0 %v1647_v0  ;;  %1490 = vmatprep.subr.bf16.mxu1 %v1647_v0  ;;  %s1327_s15 = sshll.u32 %s1784_s14, 3  ;;  %s1330_s19 = sshll.u32 %s1637_s9, 2 }
  0x17   : > { %s478_s16 = scalar_lea.vmem %s1732_s22, %s1327_s15  ;;  %s581_s17 = scalar_lea.vmem %s1747_s28, %s1327_s15 }
  0x18   : > { %v479_v47 = vld [vmem:[%s478_s16] sm:$0xff]  ;;  %s1803_s20 = sadd.s32 %s1330_s19, %s583_s18  ;;  %s1338_s8 = sshll.u32 %s1637_s9, 1 }
  0x19   : > { %1486 = vmatpush3.bf16.msra.mxu0 %v1709_v7  ;;  %1492 = vmatpush3.bf16.msra.mxu1 %v1709_v7  ;;  %s1331_s21 = sshll.u32 %s1803_s20, 3 }
  0x1a   : > { %1493 = vmatprep.subr.bf16.mxu0 %v1647_v0  ;;  %1499 = vmatprep.subr.bf16.mxu1 %v1647_v0  ;;  %s587_s23 = scalar_lea.vmem %s1732_s22, %s1331_s21  ;;  %s690_s26 = scalar_lea.vmem %s1747_s28, %s1331_s21 }
  0x1b   : > { %v588_v3 = vld [vmem:[%s587_s23] sm:$0xff]  ;;  %s1345_s21 = smul.u32 56, %s1762_s3 }
  0x1c   : > { %1402 = vmatmul.mubr.msk.f32.vlgmr.msra.gmra.mrb[0].mxu0 %vm243_vm0, %v250_v8 }
  0x1d   : > { %1495 = vmatpush3.bf16.msra.mxu0 %v1706_v5  ;;  %1423 = vmatprep.mubr.msk.f32.mxu0 %vm1648_vm1, %v1649_v1  ;;  %s1020_s23 = scalar_lea.vmem %s1732_s22, %s1345_s21 }
  0x1e   : > { %1496 = vmatprep.subr.bf16.mxu0 %v1647_v0 }
  0x21   : > { %1498 = vmatpush3.bf16.msra.mxu0 %v1709_v7 }
  0x22   : > { %1505 = vmatprep.subr.bf16.mxu0 %v1647_v0 }
  0xef   : > { %v326_v10 = vpop.f32.mrb[0].mxu0 }
  0xf0   : > { %v330_v11 = vadd.f32 %v326_v10, %v255_v9  ;;  %v1403_v12 = vpop.f32.mrb[1].mxu0 }
  0xf2   : > { %1559 = vtanh.f32 %v330_v11  ;;  %v1322_v15 = vmul.f32 -1.442695, %v330_v11 }
  0xf4   : > { %1561 = vpow2.f32 %v1322_v15 }
  0xfc   : > { %v1560_v13 = vpop.eup %1559 }
  0xfd   : > { %344 = vrot.lane.b32.xlu0 %v1560_v13, %s1650_s24 }
  0xfe   : > { %v1562_v16 = vpop.eup %1561 }
  0xff   : > { %v334_v17 = vadd.f32 1.0, %v1562_v16 }
 0x101   : > { %339 = vrot.lane.b32.xlu0 %v251_v14, %s1651_s25  ;;  %1563 = vrcp.f32 %v334_v17 }
 0x10b   : > { %v1564_v18 = vpop.eup %1563 }
 0x16f   : > { %v345_v19 = vpop.permute.xlu0 %344 }
 0x170   : > { %v347_v20 = vmul.f32 %v1564_v18, %v345_v19 }
 0x172   : > { %349 = vrot.lane.b32.xlu1 %v347_v20, %s1651_s25 }
 0x173   : > { %v340_v21 = vpop.permute.xlu0 %339 }
 0x174   : > { %v342_v22 = vmul.f32 %v1564_v18, %v340_v21 }
 0x1e4   : > { %v350_v23 = vpop.permute.xlu1 %349 }
 0x1e5   : > { %v352_v24 = vadd.f32 %v350_v23, %v342_v22 }
 0x1e7   : > { %1565 = vtanh.f32 %v352_v24 }
 0x1f1   : > { %v1566_v25 = vpop.eup %1565 }
 0x1f2   : > { %355 = vrot.lane.b32.xlu1 %v1566_v25, %s1650_s24 }
 0x264   : > { %v356_v26 = vpop.permute.xlu1 %355 }
 0x265   : > { %v358_v27 = vmul.f32 %v1564_v18, %v356_v26 }
 0x267   : > { %360 = vrot.lane.b32.xlu0 %v358_v27, %s1651_s25 }
 0x2d9   : > { %v361_v28 = vpop.permute.xlu0 %360 }
 0x2da   : > { %364 = vst.msk [vmem:[%s363_s29] sm:$0xff] %vm243_vm0, %v361_v28  ;;  %1413 = vmatmul.mubr.msk.f32.vlgmr.msra.gmra.mrb[0].mxu1 %vm243_vm0, %v361_v28  ;;  %s1334_s29 = sshll.u32 %s1762_s3, 2 }
 0x2db   : > { %1501 = vmatpush3.bf16.msra.mxu1 %v1706_v5  ;;  %1434 = vmatprep.mubr.msk.f32.mxu1 %vm1648_vm1, %v1649_v1  ;;  %s1821_s30 = sadd.s32 %s1334_s29, %s693_s27 }
 0x2dc   : > { %1502 = vmatprep.subr.bf16.mxu1 %v1647_v0  ;;  %s1335_s4 = sshll.u32 %s1821_s30, 3 }
 0x2dd   : > { %s696_s5 = scalar_lea.vmem %s1732_s22, %s1335_s4  ;;  %s799_s6 = scalar_lea.vmem %s1747_s28, %s1335_s4 }
 0x2de   : > { %v697_v23 = vld [vmem:[%s696_s5] sm:$0xff] }
 0x2df   : > { %1504 = vmatpush3.bf16.msra.mxu1 %v1709_v7 }
 0x2e0   : > { %1511 = vmatprep.subr.bf16.mxu1 %v1647_v0 }
 0x3ad   : > { %v439_v30 = vpop.f32.mrb[0].mxu1 }
 0x3ae   : > { %v443_v31 = vadd.f32 %v439_v30, %v370_v29  ;;  %v1414_v32 = vpop.f32.mrb[1].mxu1 }
 0x3b0   : > { %1567 = vtanh.f32 %v443_v31  ;;  %v1325_v34 = vmul.f32 -1.442695, %v443_v31 }
 0x3b2   : > { %1569 = vpow2.f32 %v1325_v34 }
 0x3ba   : > { %v1568_v33 = vpop.eup %1567 }
 0x3bb   : > { %453 = vrot.lane.b32.xlu1 %v1568_v33, %s1650_s24 }
 0x3bc   : > { %v1570_v35 = vpop.eup %1569 }
 0x3bd   : > { %v447_v36 = vadd.f32 1.0, %v1570_v35 }
 0x3bf   : > { %1571 = vrcp.f32 %v447_v36 }
 0x3c9   : > { %v1572_v37 = vpop.eup %1571 }
 0x3ca   : > { %v451_v40 = vmul.f32 %v1572_v37, %v352_v24 }
 0x42d   : > { %v454_v38 = vpop.permute.xlu1 %453 }
 0x42e   : > { %v456_v39 = vmul.f32 %v1572_v37, %v454_v38 }
 0x430   : > { %458 = vrot.lane.b32.xlu0 %v456_v39, %s1651_s25 }
 0x4a2   : > { %v459_v41 = vpop.permute.xlu0 %458 }
 0x4a3   : > { %v461_v42 = vadd.f32 %v459_v41, %v451_v40 }
 0x4a5   : > { %1573 = vtanh.f32 %v461_v42 }
 0x4af   : > { %v1574_v43 = vpop.eup %1573 }
 0x4b0   : > { %464 = vrot.lane.b32.xlu1 %v1574_v43, %s1650_s24 }
 0x522   : > { %v465_v44 = vpop.permute.xlu1 %464 }
 0x523   : > { %v467_v45 = vmul.f32 %v1572_v37, %v465_v44 }
 0x525   : > { %469 = vrot.lane.b32.xlu0 %v467_v45, %s1651_s25 }
 0x597   : > { %v470_v46 = vpop.permute.xlu0 %469 }
 0x598   : > { %473 = vst.msk [vmem:[%s472_s7] sm:$0xff] %vm243_vm0, %v470_v46  ;;  %1424 = vmatmul.mubr.msk.f32.vlgmr.msra.gmra.mrb[2].mxu0 %vm243_vm0, %v470_v46  ;;  %s801_s7 = smul.u32 5, %s1762_s3 }
 0x599   : > { %1507 = vmatpush3.bf16.msra.mxu0 %v1706_v5  ;;  %1445 = vmatprep.mubr.msk.f32.mxu0 %vm1648_vm1, %v1649_v1 }
 0x59a   : > { %1508 = vmatprep.subr.bf16.mxu0 %v1647_v0  ;;  %s1839_s13 = sadd.s32 %s1338_s8, %s801_s7 }
 0x59b   : > { %s1339_s14 = sshll.u32 %s1839_s13, 3 }
 0x59c   : > { %s805_s15 = scalar_lea.vmem %s1732_s22, %s1339_s14  ;;  %s908_s16 = scalar_lea.vmem %s1747_s28, %s1339_s14 }
 0x59d   : > { %1510 = vmatpush3.bf16.msra.mxu0 %v1709_v7  ;;  %v806_v41 = vld [vmem:[%s805_s15] sm:$0xff] }
 0x59e   : > { %1517 = vmatprep.subr.bf16.mxu0 %v1647_v0 }
 0x66b   : > { %v548_v48 = vpop.f32.mrb[2].mxu0 }
 0x66c   : > { %v552_v49 = vadd.f32 %v548_v48, %v479_v47  ;;  %v1425_v50 = vpop.f32.mrb[3].mxu0 }
 0x66e   : > { %1575 = vtanh.f32 %v552_v49  ;;  %v1329_v52 = vmul.f32 -1.442695, %v552_v49 }
 0x670   : > { %1577 = vpow2.f32 %v1329_v52 }
 0x678   : > { %v1576_v51 = vpop.eup %1575 }
 0x679   : > { %562 = vrot.lane.b32.xlu1 %v1576_v51, %s1650_s24 }
 0x67a   : > { %v1578_v53 = vpop.eup %1577 }
 0x67b   : > { %v556_v54 = vadd.f32 1.0, %v1578_v53 }
 0x67d   : > { %1579 = vrcp.f32 %v556_v54 }
 0x687   : > { %v1580_v55 = vpop.eup %1579 }
 0x688   : > { %v560_v58 = vmul.f32 %v1580_v55, %v461_v42 }
 0x6eb   : > { %v563_v56 = vpop.permute.xlu1 %562 }
 0x6ec   : > { %v565_v57 = vmul.f32 %v1580_v55, %v563_v56 }
 0x6ee   : > { %567 = vrot.lane.b32.xlu0 %v565_v57, %s1651_s25 }
 0x760   : > { %v568_v59 = vpop.permute.xlu0 %567 }
 0x761   : > { %v570_v60 = vadd.f32 %v568_v59, %v560_v58 }
 0x763   : > { %1581 = vtanh.f32 %v570_v60 }
 0x76d   : > { %v1582_v61 = vpop.eup %1581 }
 0x76e   : > { %573 = vrot.lane.b32.xlu1 %v1582_v61, %s1650_s24 }
 0x7e0   : > { %v574_v62 = vpop.permute.xlu1 %573 }
 0x7e1   : > { %v576_v63 = vmul.f32 %v1580_v55, %v574_v62 }
 0x7e3   : > { %578 = vrot.lane.b32.xlu0 %v576_v63, %s1651_s25 }
 0x855   : > { %v579_v2 = vpop.permute.xlu0 %578 }
 0x856   : > { %582 = vst.msk [vmem:[%s581_s17] sm:$0xff] %vm243_vm0, %v579_v2  ;;  %1435 = vmatmul.mubr.msk.f32.vlgmr.msra.gmra.mrb[2].mxu1 %vm243_vm0, %v579_v2  ;;  %s910_s17 = smul.u32 6, %s1762_s3 }
 0x857   : > { %1513 = vmatpush3.bf16.msra.mxu1 %v1706_v5  ;;  %1456 = vmatprep.mubr.msk.f32.mxu1 %vm1648_vm1, %v1649_v1 }
 0x858   : > { %1514 = vmatprep.subr.bf16.mxu1 %v1647_v0  ;;  %s1852_s18 = sadd.s32 %s1637_s9, %s910_s17 }
 0x859   : > { %s1342_s19 = sshll.u32 %s1852_s18, 3 }
 0x85a   : > { %s913_s20 = scalar_lea.vmem %s1732_s22, %s1342_s19  ;;  %s1016_s9 = scalar_lea.vmem %s1747_s28, %s1342_s19 }
 0x85b   : > { %1516 = vmatpush3.bf16.msra.mxu1 %v1709_v7  ;;  %v914_v55 = vld [vmem:[%s913_s20] sm:$0xff]  ;;  %s1652_s22 = smov 96  }
 0x85c   : > { %1523 = vmatprep.subr.bf16.mxu1 %v1647_v0 }
 0x929   : > { %v657_v4 = vpop.f32.mrb[2].mxu1 }
 0x92a   : > { %v661_v6 = vadd.f32 %v657_v4, %v588_v3  ;;  %v1436_v8 = vpop.f32.mrb[3].mxu1 }
 0x92c   : > { %1583 = vtanh.f32 %v661_v6  ;;  %v1333_v10 = vmul.f32 -1.442695, %v661_v6 }
 0x92e   : > { %1585 = vpow2.f32 %v1333_v10 }
 0x936   : > { %v1584_v9 = vpop.eup %1583 }
 0x937   : > { %671 = vrot.lane.b32.xlu1 %v1584_v9, %s1650_s24 }
 0x938   : > { %v1586_v11 = vpop.eup %1585 }
 0x939   : > { %v665_v12 = vadd.f32 1.0, %v1586_v11 }
 0x93b   : > { %1587 = vrcp.f32 %v665_v12 }
 0x945   : > { %v1588_v13 = vpop.eup %1587 }
 0x946   : > { %v669_v16 = vmul.f32 %v1588_v13, %v570_v60 }
 0x9a9   : > { %v672_v14 = vpop.permute.xlu1 %671 }
 0x9aa   : > { %v674_v15 = vmul.f32 %v1588_v13, %v672_v14 }
 0x9ac   : > { %676 = vrot.lane.b32.xlu0 %v674_v15, %s1651_s25 }
 0xa1e   : > { %v677_v17 = vpop.permute.xlu0 %676 }
 0xa1f   : > { %v679_v18 = vadd.f32 %v677_v17, %v669_v16 }
 0xa21   : > { %1589 = vtanh.f32 %v679_v18 }
 0xa2b   : > { %v1590_v19 = vpop.eup %1589 }
 0xa2c   : > { %682 = vrot.lane.b32.xlu1 %v1590_v19, %s1650_s24 }
 0xa9e   : > { %v683_v20 = vpop.permute.xlu1 %682 }
 0xa9f   : > { %v685_v21 = vmul.f32 %v1588_v13, %v683_v20  ;;  %v1021_v13 = vld [vmem:[%s1020_s23] sm:$0xff] }
 0xaa1   : > { %687 = vrot.lane.b32.xlu0 %v685_v21, %s1651_s25 }
 0xb13   : > { %v688_v22 = vpop.permute.xlu0 %687 }
 0xb14   : > { %691 = vst.msk [vmem:[%s690_s26] sm:$0xff] %vm243_vm0, %v688_v22  ;;  %1446 = vmatmul.mubr.msk.f32.vlgmr.msra.gmra.mrb[4].mxu0 %vm243_vm0, %v688_v22  ;;  %s1123_s26 = scalar_lea.vmem %s1747_s28, %s1345_s21 }
 0xb15   : > { %1519 = vmatpush3.bf16.msra.mxu0 %v1706_v5  ;;  %1467 = vmatprep.mubr.msk.f32.mxu0 %vm1648_vm1, %v1649_v1 }
 0xb16   : > { %1520 = vmatprep.subr.bf16.mxu0 %v1647_v0 }
 0xb19   : > { %1522 = vmatpush3.bf16.msra.mxu0 %v1709_v7 }
 0xbe7   : > { %v766_v24 = vpop.f32.mrb[4].mxu0 }
 0xbe8   : > { %v770_v25 = vadd.f32 %v766_v24, %v697_v23  ;;  %v1447_v26 = vpop.f32.mrb[5].mxu0 }
 0xbea   : > { %1591 = vtanh.f32 %v770_v25  ;;  %v1337_v28 = vmul.f32 -1.442695, %v770_v25 }
 0xbec   : > { %1593 = vpow2.f32 %v1337_v28 }
 0xbf4   : > { %v1592_v27 = vpop.eup %1591 }
 0xbf5   : > { %780 = vrot.lane.b32.xlu1 %v1592_v27, %s1650_s24 }
 0xbf6   : > { %v1594_v29 = vpop.eup %1593 }
 0xbf7   : > { %v774_v30 = vadd.f32 1.0, %v1594_v29 }
 0xbf9   : > { %1595 = vrcp.f32 %v774_v30 }
 0xc03   : > { %v1596_v31 = vpop.eup %1595 }
 0xc04   : > { %v778_v34 = vmul.f32 %v1596_v31, %v679_v18 }
 0xc67   : > { %v781_v32 = vpop.permute.xlu1 %780 }
 0xc68   : > { %v783_v33 = vmul.f32 %v1596_v31, %v781_v32 }
 0xc6a   : > { %785 = vrot.lane.b32.xlu0 %v783_v33, %s1651_s25 }
 0xcdc   : > { %v786_v35 = vpop.permute.xlu0 %785 }
 0xcdd   : > { %v788_v36 = vadd.f32 %v786_v35, %v778_v34 }
 0xcdf   : > { %1597 = vtanh.f32 %v788_v36 }
 0xce9   : > { %v1598_v37 = vpop.eup %1597 }
 0xcea   : > { %791 = vrot.lane.b32.xlu1 %v1598_v37, %s1650_s24 }
 0xd5c   : > { %v792_v38 = vpop.permute.xlu1 %791 }
 0xd5d   : > { %v794_v39 = vmul.f32 %v1596_v31, %v792_v38 }
 0xd5f   : > { %796 = vrot.lane.b32.xlu0 %v794_v39, %s1651_s25 }
 0xdd1   : > { %v797_v40 = vpop.permute.xlu0 %796 }
 0xdd2   : > { %800 = vst.msk [vmem:[%s799_s6] sm:$0xff] %vm243_vm0, %v797_v40  ;;  %1457 = vmatmul.mubr.msk.f32.vlgmr.msra.gmra.mrb[4].mxu1 %vm243_vm0, %v797_v40 }
 0xdd3   : > { %1525 = vmatpush3.bf16.msra.mxu1 %v1706_v5  ;;  %1478 = vmatprep.mubr.msk.f32.mxu1 %vm1648_vm1, %v1649_v1 }
 0xdd4   : > { %1526 = vmatprep.subr.bf16.mxu1 %v1647_v0 }
 0xdd7   : > { %1528 = vmatpush3.bf16.msra.mxu1 %v1709_v7 }
 0xea5   : > { %v875_v42 = vpop.f32.mrb[4].mxu1 }
 0xea6   : > { %v879_v43 = vadd.f32 %v875_v42, %v806_v41  ;;  %v1458_v44 = vpop.f32.mrb[5].mxu1 }
 0xea8   : > { %1599 = vtanh.f32 %v879_v43  ;;  %v1341_v1 = vmul.f32 -1.442695, %v879_v43 }
 0xeaa   : > { %1601 = vpow2.f32 %v1341_v1 }
 0xeb2   : > { %v1600_v5 = vpop.eup %1599 }
 0xeb3   : > { %889 = vrot.lane.b32.xlu1 %v1600_v5, %s1650_s24 }
 0xeb4   : > { %v1602_v0 = vpop.eup %1601 }
 0xeb5   : > { %v883_v7 = vadd.f32 1.0, %v1602_v0 }
 0xeb7   : > { %1603 = vrcp.f32 %v883_v7 }
 0xec1   : > { %v1604_v45 = vpop.eup %1603 }
 0xec2   : > { %v887_v48 = vmul.f32 %v1604_v45, %v788_v36 }
 0xf25   : > { %v890_v46 = vpop.permute.xlu1 %889 }
 0xf26   : > { %v892_v47 = vmul.f32 %v1604_v45, %v890_v46 }
 0xf28   : > { %894 = vrot.lane.b32.xlu0 %v892_v47, %s1651_s25 }
 0xf9a   : > { %v895_v49 = vpop.permute.xlu0 %894 }
 0xf9b   : > { %v897_v50 = vadd.f32 %v895_v49, %v887_v48 }
 0xf9d   : > { %1605 = vtanh.f32 %v897_v50 }
 0xfa7   : > { %v1606_v51 = vpop.eup %1605 }
 0xfa8   : > { %900 = vrot.lane.b32.xlu1 %v1606_v51, %s1650_s24 }
0x101a   : > { %v901_v52 = vpop.permute.xlu1 %900 }
0x101b   : > { %v903_v53 = vmul.f32 %v1604_v45, %v901_v52 }
0x101d   : > { %905 = vrot.lane.b32.xlu0 %v903_v53, %s1651_s25 }
0x108f   : > { %v906_v54 = vpop.permute.xlu0 %905 }
0x1090   : > { %909 = vst.msk [vmem:[%s908_s16] sm:$0xff] %vm243_vm0, %v906_v54  ;;  %1468 = vmatmul.mubr.msk.f32.vlgmr.msra.gmra.mrb[6].mxu0 %vm243_vm0, %v906_v54 }
0x1163   : > { %v983_v56 = vpop.f32.mrb[6].mxu0 }
0x1164   : > { %v987_v57 = vadd.f32 %v983_v56, %v914_v55  ;;  %v1469_v58 = vpop.f32.mrb[7].mxu0 }
0x1166   : > { %1607 = vtanh.f32 %v987_v57  ;;  %v1344_v60 = vmul.f32 -1.442695, %v987_v57 }
0x1168   : > { %1609 = vpow2.f32 %v1344_v60 }
0x1170   : > { %v1608_v59 = vpop.eup %1607 }
0x1171   : > { %997 = vrot.lane.b32.xlu1 %v1608_v59, %s1650_s24 }
0x1172   : > { %v1610_v61 = vpop.eup %1609 }
0x1173   : > { %v991_v62 = vadd.f32 1.0, %v1610_v61 }
0x1175   : > { %1611 = vrcp.f32 %v991_v62 }
0x117f   : > { %v1612_v63 = vpop.eup %1611 }
0x1180   : > { %v995_v4 = vmul.f32 %v1612_v63, %v897_v50 }
0x11e3   : > { %v998_v2 = vpop.permute.xlu1 %997 }
0x11e4   : > { %v1000_v3 = vmul.f32 %v1612_v63, %v998_v2 }
0x11e6   : > { %1002 = vrot.lane.b32.xlu0 %v1000_v3, %s1651_s25 }
0x1258   : > { %v1003_v6 = vpop.permute.xlu0 %1002 }
0x1259   : > { %v1005_v8 = vadd.f32 %v1003_v6, %v995_v4 }
0x125b   : > { %1613 = vtanh.f32 %v1005_v8 }
0x1265   : > { %v1614_v9 = vpop.eup %1613 }
0x1266   : > { %1008 = vrot.lane.b32.xlu1 %v1614_v9, %s1650_s24 }
0x12d8   : > { %v1009_v10 = vpop.permute.xlu1 %1008 }
0x12d9   : > { %v1011_v11 = vmul.f32 %v1612_v63, %v1009_v10 }
0x12db   : > { %1013 = vrot.lane.b32.xlu0 %v1011_v11, %s1651_s25 }
0x134d   : > { %v1014_v12 = vpop.permute.xlu0 %1013 }
0x134e   : > { %1017 = vst.msk [vmem:[%s1016_s9] sm:$0xff] %vm243_vm0, %v1014_v12  ;;  %1479 = vmatmul.mubr.msk.f32.vlgmr.msra.gmra.mrb[6].mxu1 %vm243_vm0, %v1014_v12 }
0x1421   : > { %v1090_v14 = vpop.f32.mrb[6].mxu1 }
0x1422   : > { %v1094_v15 = vadd.f32 %v1090_v14, %v1021_v13  ;;  %v1480_v16 = vpop.f32.mrb[7].mxu1 }
0x1424   : > { %1615 = vtanh.f32 %v1094_v15  ;;  %v1347_v18 = vmul.f32 -1.442695, %v1094_v15 }
0x1426   : > { %1617 = vpow2.f32 %v1347_v18 }
0x142e   : > { %v1616_v17 = vpop.eup %1615 }
0x142f   : > { %1104 = vrot.lane.b32.xlu1 %v1616_v17, %s1650_s24 }
0x1430   : > { %v1618_v19 = vpop.eup %1617 }
0x1431   : > { %v1098_v20 = vadd.f32 1.0, %v1618_v19 }
0x1433   : > { %1619 = vrcp.f32 %v1098_v20 }
0x143d   : > { %v1620_v21 = vpop.eup %1619 }
0x143e   : > { %v1102_v24 = vmul.f32 %v1620_v21, %v1005_v8 }
0x14a1   : > { %v1105_v22 = vpop.permute.xlu1 %1104 }
0x14a2   : > { %v1107_v23 = vmul.f32 %v1620_v21, %v1105_v22 }
0x14a4   : > { %1109 = vrot.lane.b32.xlu0 %v1107_v23, %s1651_s25 }
0x1516   : > { %v1110_v25 = vpop.permute.xlu0 %1109 }
0x1517   : > { %v1112_v26 = vadd.f32 %v1110_v25, %v1102_v24 }
0x1519   : > { %1621 = vtanh.f32 %v1112_v26 }
0x1523   : > { %v1622_v27 = vpop.eup %1621 }
0x1524   : > { %1115 = vrot.lane.b32.xlu1 %v1622_v27, %s1650_s24 }
0x1528   : > { %1127 = vrot.lane.b32.xlu1 %v1112_v26, %s1652_s22 }
0x1596   : > { %v1116_v28 = vpop.permute.xlu1 %1115 }
0x1597   : > { %v1118_v29 = vmul.f32 %v1620_v21, %v1116_v28 }
0x1599   : > { %1120 = vrot.lane.b32.xlu0 %v1118_v29, %s1651_s25 }
0x159a   : > { %v1128_v30 = vpop.permute.xlu1 %1127 }
0x159b   : > { %1130 = vst.msk [vmem:[#allocation3] sm:$0xff] %vm243_vm0, %v1128_v30 }
0x160b   : > { %v1121_v31 = vpop.permute.xlu0 %1120 }
0x160c   : > { %1124 = vst.msk [vmem:[%s1123_s26] sm:$0xff] %vm243_vm0, %v1121_v31  ;;  %1125 = vst.msk [vmem:[#allocation2] sm:$0xff] %vm243_vm0, %v1121_v31 }
0x160d PF: > { %s12_s11 = sadd.s32 1, %s1645_s11   ;;  %s1889_s9 = smov %s1641_s10 }
0x160e   : > { %p9_p5 = scmp.ge.s32.totalorder %s12_s11, 4   ;;  %s1890_s10 = smov %s1892_s12 }
0x1610   :  { %11 = sbr.rel (!%p9_p5) target bundleno = 2 (0x2), region = 81 }

</bundles_post_ra>
